<compile_context>
chip_gen: v7x
topology: tpu7x:2x2x1
jax: 0.10.0
libtpu: 0.0.40
codegen_flags: <defaults>
</compile_context>

<pallas_src>
import math

import jax
import jax.numpy as jnp
from jax.experimental import pallas as pl
from jax.experimental.pallas import tpu as pltpu


def _round_up(x, m):
    return ((x + m - 1) // m) * m


def logreg_curve_kernel(coeffs_ref, x_ref, w_ref, b_ref, o_ref):
    """coeffs_ref: SMEM (K,)             f32  (scalar-prefetched curve coefficients)
       x_ref:      VMEM (B_tile, D_tile) f32
       w_ref:      VMEM (K, D_tile, C)   f32  (resident when the D grid has 1 step)
       b_ref:      VMEM (K, 1, C)        f32  (constant index_map -> fetched once)
       o_ref:      VMEM (B_tile, C)      f32  (resident across the D axis)
    """
    j = pl.program_id(1)                      # D (reduction) axis, "arbitrary"
    K = w_ref.shape[0]

    # bf16 operands on the MXU, f32 scaling/accumulation.  Casting per-tile on
    # the VPU keeps HBM traffic at the original f32 bytes (no pre-cast pass).
    x = x_ref[...].astype(jnp.bfloat16)
    acc = coeffs_ref[0] * jnp.dot(x, w_ref[0].astype(jnp.bfloat16),
                                  preferred_element_type=jnp.float32)
    for k in range(1, K):                     # K is small & static -> unrolled
        acc = acc + coeffs_ref[k] * jnp.dot(x, w_ref[k].astype(jnp.bfloat16),
                                            preferred_element_type=jnp.float32)

    @pl.when(j == 0)
    def _first_step():                        # bias folded into the first step
        b = coeffs_ref[0] * b_ref[0]
        for k in range(1, K):
            b = b + coeffs_ref[k] * b_ref[k]
        o_ref[...] = acc + b

    @pl.when(j > 0)
    def _accumulate():
        o_ref[...] += acc


def log_regression_curve(x, coeffs_t, weights_kdc, biases_kc,
                         *, b_tile_max=128, vmem_budget_bytes=12 << 20):
    """x:           (B, ...) — flattened to (B, in_dim) like torch .view(B, -1)
       coeffs_t:    (K,) curve coefficients
       weights_kdc: (K, in_dim, num_classes)   (transposed for x @ W)
       biases_kc:   (K, num_classes)
       returns:     (B, num_classes) float32
    """
    B = x.shape[0]
    x2 = x.reshape(B, -1)                     # torch .view(B, -1)
    D = x2.shape[1]
    K, D_w, C = weights_kdc.shape
    assert D == D_w, f"in_dim mismatch: {D} vs {D_w}"
    assert biases_kc.shape == (K, C)

    C_lane = _round_up(C, 128)                # lane-padded VMEM footprint of C

    # ---- batch tiling (sublane aligned; cap limits accumulator vreg pressure) --
    B_tile = min(_round_up(B, 8), b_tile_max)
    B_pad = _round_up(B, B_tile)

    # ---- reduction (in_dim) tiling ---------------------------------------------
    # Per-unit-D VMEM bytes: double-buffered f32 x & w streams plus the in-kernel
    # bf16 copies (VMEM stores C lane-padded to 128).
    bytes_per_row = (2 * B_tile * 4 + B_tile * 2
                     + 2 * K * C_lane * 4 + K * C_lane * 2)
    d_cap = max((vmem_budget_bytes // bytes_per_row) // 128 * 128, 128)
    if D <= d_cap:
        # Whole reduction in one step: weight block index is constant, so the
        # weight stack streams from HBM exactly once (VMEM-resident).
        D_tile, D_pad = D, D
    else:
        D_tile = d_cap
        D_pad = _round_up(D, D_tile)

    # ---- operand prep -----------------------------------------------------------
    # No dtype conversion and no C padding here (that would add a full extra HBM
    # pass over the weights).  Zero-padding is applied only when shapes force it
    # and is exact for the matmul.
    xb = x2 if (B_pad == B and D_pad == D) else jnp.pad(
        x2, ((0, B_pad - B), (0, D_pad - D)))
    wb = weights_kdc if D_pad == D else jnp.pad(
        weights_kdc, ((0, 0), (0, D_pad - D), (0, 0)))
    bb = biases_kc.reshape(K, 1, C)
    coeffs = coeffs_t.astype(jnp.float32)

    grid = (B_pad // B_tile, D_pad // D_tile)

    # ---- VMEM limit from the actual (lane-padded) working set -------------------
    d_lane = _round_up(D_tile, 128)
    working = (2 * B_tile * d_lane * 4 + B_tile * d_lane * 2            # x f32 + bf16
               + 2 * K * D_tile * C_lane * 4 + K * D_tile * C_lane * 2  # w f32 + bf16
               + 2 * K * C_lane * 4                                     # bias
               + 2 * B_tile * C_lane * 4)                               # output
    vmem_limit = int(min(max(working + working // 4 + (1 << 20), 4 << 20), 32 << 20))

    cost = pl.CostEstimate(
        flops=2 * K * B * D * C,
        transcendentals=0,
        bytes_accessed=(x2.size * x2.dtype.itemsize
                        + weights_kdc.size * weights_kdc.dtype.itemsize
                        + biases_kc.size * biases_kc.dtype.itemsize
                        + B * C * 4),
    )

    out = pl.pallas_call(
        logreg_curve_kernel,
        out_shape=jax.ShapeDtypeStruct((B_pad, C), jnp.float32),
        grid_spec=pltpu.PrefetchScalarGridSpec(
            num_scalar_prefetch=1,                   # coeffs_t -> SMEM
            grid=grid,
            in_specs=[
                pl.BlockSpec((B_tile, D_tile), lambda i, j, c: (i, j)),
                pl.BlockSpec((K, D_tile, C), lambda i, j, c: (0, j, 0)),
                pl.BlockSpec((K, 1, C), lambda i, j, c: (0, 0, 0)),
            ],
            out_specs=pl.BlockSpec((B_tile, C), lambda i, j, c: (i, 0)),
        ),
        compiler_params=pltpu.CompilerParams(
            dimension_semantics=("parallel", "arbitrary"),
            vmem_limit_bytes=vmem_limit,
        ),
        cost_estimate=cost,
    )(coeffs, xb, wb, bb)

    return out[:B]        # drop batch padding; no class padding to slice off


if __name__ == "__main__":
    # Module-consistent small shapes:
    #   batch=2, input image (4, 16, 16) -> in_dim = 1024, num_classes=10,
    #   fix_points -> K=3 curve coefficients.
    B, Cin, H, W = 2, 4, 16, 16
    in_dim = Cin * H * W
    num_classes = 10
    K = 3

    key = jax.random.PRNGKey(0)
    kx, kw, kb = jax.random.split(key, 3)

    x = jax.random.normal(kx, (B, Cin, H, W), dtype=jnp.float32)

    bound = 1.0 / math.sqrt(in_dim)              # curves.Linear-style init range
    weights = jax.random.uniform(kw, (K, in_dim, num_classes),
                                 minval=-bound, maxval=bound, dtype=jnp.float32)
    biases = jax.random.uniform(kb, (K, num_classes),
                                minval=-bound, maxval=bound, dtype=jnp.float32)
    coeffs_t = jnp.array([0.25, 0.50, 0.25], dtype=jnp.float32)

    out = log_regression_curve(x, coeffs_t, weights, biases)
    out = jax.block_until_ready(out)

    # Full-f32 module reference.
    x2 = x.reshape(B, -1)
    w_comb = jnp.einsum("k,kdc->dc", coeffs_t, weights)
    b_comb = jnp.einsum("k,kc->c", coeffs_t, biases)
    ref_f32 = x2 @ w_comb + b_comb

    # Matched-precision reference (bf16 operands on the MXU, f32 scale/accum),
    # mirroring the kernel's arithmetic.
    x_bf = x2.astype(jnp.bfloat16)
    w_bf = weights.astype(jnp.bfloat16)
    ref_bf = sum(coeffs_t[k] * jnp.dot(x_bf, w_bf[k],
                                       preferred_element_type=jnp.float32)
                 for k in range(K)) + b_comb

    assert out.shape == (B, num_classes)
    assert jnp.allclose(out, ref_bf, atol=1e-3, rtol=1e-3), "mismatch vs matched-precision ref"
    assert jnp.allclose(out, ref_f32, atol=3e-2, rtol=3e-2), "mismatch vs f32 module ref"
    print("KERNEL_OK")
</pallas_src>

<mosaic_0001>
module attributes {stable_mosaic.version = 11 : i64} {
  func.func @logreg_curve_kernel(%arg0: i32, %arg1: i32, %arg2: memref<3xf32, #tpu.memory_space<smem>>, %arg3: memref<8x1024xf32, #tpu.memory_space<vmem>>, %arg4: memref<3x1024x10xf32, #tpu.memory_space<vmem>>, %arg5: memref<3x1x10xf32, #tpu.memory_space<vmem>>, %arg6: memref<8x10xf32, #tpu.memory_space<vmem>>) attributes {dimension_semantics = [#tpu.dimension_semantics<parallel>, #tpu.dimension_semantics<arbitrary>], iteration_bounds = array<i64: 1, 1>, scalar_prefetch = 1 : i64, scratch_operands = 0 : i64, tpu.core_type = #tpu.core_type<tc>, window_params = [{transform_indices = @transform_0, window_bounds = array<i64: 8, 1024>}, {transform_indices = @transform_1, window_bounds = array<i64: 3, 1024, 10>}, {pipeline_mode = #tpu.pipeline_mode<synchronous>, transform_indices = @transform_2, window_bounds = array<i64: 3, 1, 10>}, {transform_indices = @transform_3, window_bounds = array<i64: 8, 10>}]} {
    %c0 = arith.constant 0 : index
    %c0_0 = arith.constant 0 : index
    %0 = vector.load %arg3[%c0, %c0_0] : memref<8x1024xf32, #tpu.memory_space<vmem>>, vector<8x1024xf32>
    %1 = arith.truncf %0 : vector<8x1024xf32> to vector<8x1024xbf16>
    %c0_1 = arith.constant 0 : index
    %2 = memref.load %arg2[%c0_1] : memref<3xf32, #tpu.memory_space<smem>>
    %c0_2 = arith.constant 0 : index
    %c0_3 = arith.constant 0 : index
    %c0_4 = arith.constant 0 : index
    %3 = vector.load %arg4[%c0_2, %c0_3, %c0_4] : memref<3x1024x10xf32, #tpu.memory_space<vmem>>, vector<1x1024x10xf32>
    %4 = vector.shape_cast %3 : vector<1x1024x10xf32> to vector<1024x10xf32>
    %5 = arith.truncf %4 : vector<1024x10xf32> to vector<1024x10xbf16>
    %cst = arith.constant dense<0.000000e+00> : vector<8x10xf32>
    %6 = tpu.matmul %1, %5, %cst {dimension_numbers = #tpu.dot_dimension_numbers<[1], [0], [0], [1], [0, 0, 1, 1], [], []>} : vector<8x1024xbf16>, vector<1024x10xbf16>, vector<8x10xf32> -> vector<8x10xf32>
    %7 = vector.broadcast %2 : f32 to vector<8x10xf32>
    %8 = arith.mulf %7, %6 : vector<8x10xf32>
    %c1 = arith.constant 1 : index
    %9 = memref.load %arg2[%c1] : memref<3xf32, #tpu.memory_space<smem>>
    %c1_5 = arith.constant 1 : index
    %c0_6 = arith.constant 0 : index
    %c0_7 = arith.constant 0 : index
    %10 = vector.load %arg4[%c1_5, %c0_6, %c0_7] : memref<3x1024x10xf32, #tpu.memory_space<vmem>>, vector<1x1024x10xf32>
    %11 = vector.shape_cast %10 : vector<1x1024x10xf32> to vector<1024x10xf32>
    %12 = arith.truncf %11 : vector<1024x10xf32> to vector<1024x10xbf16>
    %cst_8 = arith.constant dense<0.000000e+00> : vector<8x10xf32>
    %13 = tpu.matmul %1, %12, %cst_8 {dimension_numbers = #tpu.dot_dimension_numbers<[1], [0], [0], [1], [0, 0, 1, 1], [], []>} : vector<8x1024xbf16>, vector<1024x10xbf16>, vector<8x10xf32> -> vector<8x10xf32>
    %14 = vector.broadcast %9 : f32 to vector<8x10xf32>
    %15 = arith.mulf %14, %13 : vector<8x10xf32>
    %16 = arith.addf %8, %15 : vector<8x10xf32>
    %c2 = arith.constant 2 : index
    %17 = memref.load %arg2[%c2] : memref<3xf32, #tpu.memory_space<smem>>
    %c2_9 = arith.constant 2 : index
    %c0_10 = arith.constant 0 : index
    %c0_11 = arith.constant 0 : index
    %18 = vector.load %arg4[%c2_9, %c0_10, %c0_11] : memref<3x1024x10xf32, #tpu.memory_space<vmem>>, vector<1x1024x10xf32>
    %19 = vector.shape_cast %18 : vector<1x1024x10xf32> to vector<1024x10xf32>
    %20 = arith.truncf %19 : vector<1024x10xf32> to vector<1024x10xbf16>
    %cst_12 = arith.constant dense<0.000000e+00> : vector<8x10xf32>
    %21 = tpu.matmul %1, %20, %cst_12 {dimension_numbers = #tpu.dot_dimension_numbers<[1], [0], [0], [1], [0, 0, 1, 1], [], []>} : vector<8x1024xbf16>, vector<1024x10xbf16>, vector<8x10xf32> -> vector<8x10xf32>
    %22 = vector.broadcast %17 : f32 to vector<8x10xf32>
    %23 = arith.mulf %22, %21 : vector<8x10xf32>
    %24 = arith.addf %16, %23 : vector<8x10xf32>
    %c0_i32 = arith.constant 0 : i32
    %25 = arith.cmpi eq, %arg1, %c0_i32 : i32
    %26 = arith.extui %25 : i1 to i32
    %c0_i32_13 = arith.constant 0 : i32
    %27 = arith.cmpi ne, %26, %c0_i32_13 : i32
    scf.if %27 {
      %c0_16 = arith.constant 0 : index
      %31 = memref.load %arg2[%c0_16] : memref<3xf32, #tpu.memory_space<smem>>
      %c0_17 = arith.constant 0 : index
      %c0_18 = arith.constant 0 : index
      %c0_19 = arith.constant 0 : index
      %32 = vector.load %arg5[%c0_17, %c0_18, %c0_19] : memref<3x1x10xf32, #tpu.memory_space<vmem>>, vector<1x1x10xf32>
      %33 = vector.shape_cast %32 : vector<1x1x10xf32> to vector<1x10xf32>
      %34 = vector.broadcast %31 : f32 to vector<1x10xf32>
      %35 = arith.mulf %34, %33 : vector<1x10xf32>
      %c1_20 = arith.constant 1 : index
      %36 = memref.load %arg2[%c1_20] : memref<3xf32, #tpu.memory_space<smem>>
      %c1_21 = arith.constant 1 : index
      %c0_22 = arith.constant 0 : index
      %c0_23 = arith.constant 0 : index
      %37 = vector.load %arg5[%c1_21, %c0_22, %c0_23] : memref<3x1x10xf32, #tpu.memory_space<vmem>>, vector<1x1x10xf32>
      %38 = vector.shape_cast %37 : vector<1x1x10xf32> to vector<1x10xf32>
      %39 = vector.broadcast %36 : f32 to vector<1x10xf32>
      %40 = arith.mulf %39, %38 : vector<1x10xf32>
      %41 = arith.addf %35, %40 : vector<1x10xf32>
      %c2_24 = arith.constant 2 : index
      %42 = memref.load %arg2[%c2_24] : memref<3xf32, #tpu.memory_space<smem>>
      %c2_25 = arith.constant 2 : index
      %c0_26 = arith.constant 0 : index
      %c0_27 = arith.constant 0 : index
      %43 = vector.load %arg5[%c2_25, %c0_26, %c0_27] : memref<3x1x10xf32, #tpu.memory_space<vmem>>, vector<1x1x10xf32>
      %44 = vector.shape_cast %43 : vector<1x1x10xf32> to vector<1x10xf32>
      %45 = vector.broadcast %42 : f32 to vector<1x10xf32>
      %46 = arith.mulf %45, %44 : vector<1x10xf32>
      %47 = arith.addf %41, %46 : vector<1x10xf32>
      %48 = vector.broadcast %47 : vector<1x10xf32> to vector<8x10xf32>
      %49 = arith.addf %24, %48 : vector<8x10xf32>
      %c0_28 = arith.constant 0 : index
      %c0_29 = arith.constant 0 : index
      %50 = vector.load %arg6[%c0_28, %c0_29] : memref<8x10xf32, #tpu.memory_space<vmem>>, vector<8x10xf32>
      tpu.vector_store %arg6[%c0_28, %c0_29], %49 {strides = array<i32>} : memref<8x10xf32, #tpu.memory_space<vmem>>, vector<8x10xf32>,
    } else {
    }
    %c0_i32_14 = arith.constant 0 : i32
    %28 = arith.cmpi sgt, %arg1, %c0_i32_14 : i32
    %29 = arith.extui %28 : i1 to i32
    %c0_i32_15 = arith.constant 0 : i32
    %30 = arith.cmpi ne, %29, %c0_i32_15 : i32
    scf.if %30 {
      %c0_16 = arith.constant 0 : index
      %c0_17 = arith.constant 0 : index
      %31 = vector.load %arg6[%c0_16, %c0_17] : memref<8x10xf32, #tpu.memory_space<vmem>>, vector<8x10xf32>
      %32 = arith.addf %31, %24 : vector<8x10xf32>
      %c0_18 = arith.constant 0 : index
      %c0_19 = arith.constant 0 : index
      %33 = vector.load %arg6[%c0_18, %c0_19] : memref<8x10xf32, #tpu.memory_space<vmem>>, vector<8x10xf32>
      tpu.vector_store %arg6[%c0_18, %c0_19], %32 {strides = array<i32>} : memref<8x10xf32, #tpu.memory_space<vmem>>, vector<8x10xf32>,
    } else {
    }
    return
  }
  func.func @transform_0(%arg0: i32, %arg1: i32, %arg2: memref<3xf32, #tpu.memory_space<smem>>) -> (i32, i32) {
    %c0_i32 = arith.constant 0 : i32
    return %arg0, %arg1 : i32, i32
  }
  func.func @transform_1(%arg0: i32, %arg1: i32, %arg2: memref<3xf32, #tpu.memory_space<smem>>) -> (i32, i32, i32) {
    %c0_i32 = arith.constant 0 : i32
    %c0_i32_0 = arith.constant 0 : i32
    %c0_i32_1 = arith.constant 0 : i32
    return %c0_i32, %arg1, %c0_i32_0 : i32, i32, i32
  }
  func.func @transform_2(%arg0: i32, %arg1: i32, %arg2: memref<3xf32, #tpu.memory_space<smem>>) -> (i32, i32, i32) {
    %c0_i32 = arith.constant 0 : i32
    %c0_i32_0 = arith.constant 0 : i32
    %c0_i32_1 = arith.constant 0 : i32
    %c0_i32_2 = arith.constant 0 : i32
    return %c0_i32, %c0_i32_0, %c0_i32_1 : i32, i32, i32
  }
  func.func @transform_3(%arg0: i32, %arg1: i32, %arg2: memref<3xf32, #tpu.memory_space<smem>>) -> (i32, i32) {
    %c0_i32 = arith.constant 0 : i32
    %c0_i32_0 = arith.constant 0 : i32
    return %arg0, %c0_i32 : i32, i32
  }
}

</mosaic_0001>

<bundles_post_ra>
// kernel: tpu_custom_call.1
= control target key start
LH: loop header
LB: loop body
LE: loop exit
PB: predicated region body
PF: predicated region fallthrough
CT: control target
= control target key end

     0   :  { %s2998_s0 = inlined_call_operand.vmem [shape: f32[3], index: 0, kind: input, shape index: {}]   ;;  %s2999_s1 = inlined_call_operand.vmem [shape: f32[8,1024], index: 1, kind: input, shape index: {}]   ;;  %s3000_s2 = inlined_call_operand.vmem [shape: f32[3,1024,10], index: 2, kind: input, shape index: {}]   ;;  %s3001_s3 = inlined_call_operand.vmem [shape: f32[3,1,10], index: 3, kind: input, shape index: {}]   ;;  %s3002_s4 = inlined_call_operand.hbm [shape: f32[8,10], index: 4, kind: output, shape index: {}]  }
   0x1   :  { %s9_s17 = sshll.u32 %s2998_s0, 4  ;;  %s10_s17 = int_to_ptr.vmem [resolvable:$true] %s9_s17 }
   0x2   :  { %s1687_s18 = scalar_lea.vmem %s10_s17, 16  ;;  %p1692_p1 = scmp.lt.s32.totalorder %s10_s17, %s10_s17 }
   0x3   :  { %p1688_p0 = scmp.ne.s32.totalorder %s10_s17, %s1687_s18  ;;  %p1693_p2 = scmp.lt.s32.totalorder %s1687_s18, %s1687_s18 }
   0x5   :  { %p1694_p3 = por %p1693_p2, %p1692_p1 }
   0x7   :  { %p1695_p4 = pnand %p1694_p3, %p1688_p0 }
   0x9   :  { %1698 = shalt.err (!%p1695_p4)  }
   0xa   :  { %s1725_s19 = smov [#allocation3]  }
   0xb   :  { %12 = dma.vmem_to_smem %s10_s17, 16, %s1725_s19, [#allocation2] }
   0xc   :  { %1721 = dma.done.wait [#allocation2], 16 }
   0xd   :  { %1722 = vsyncadd [#allocation2], 4294967280 }
   0xe   :  { %14 = sfence }
   0xf   :  { %v56_v0 = vld [vmem:[%s3000_s2 + $0x80] sm:$0xff]  ;;  %v57_v1 = vld [vmem:[%s3000_s2 + $0x88] sm:$0xff]  ;;  %v58_v11 = vld [vmem:[%s3000_s2 + $0x90] sm:$0xff] }
  0x10   :  { %v88_v2 = vld [vmem:[%s3000_s2 + $0x180] sm:$0xff]  ;;  %v176_v3 = vpack.c.bf16 %v57_v1, %v56_v0  ;;  %v89_v4 = vld [vmem:[%s3000_s2 + $0x188] sm:$0xff]  ;;  %v59_v13 = vld [vmem:[%s3000_s2 + $0x98] sm:$0xff] }
  0x11   :  { %v40_v5 = vld [vmem:[%s3000_s2] sm:$0xff]  ;;  %v41_v6 = vld [vmem:[%s3000_s2 + $0x8] sm:$0xff]  ;;  %v192_v7 = vpack.c.bf16 %v89_v4, %v88_v2  ;;  %v90_v14 = vld [vmem:[%s3000_s2 + $0x190] sm:$0xff]  ;;  %v177_v16 = vpack.c.bf16 %v59_v13, %v58_v11 }
  0x12   :  { %v168_v8 = vpack.c.bf16 %v41_v6, %v40_v5  ;;  %v72_v9 = vld [vmem:[%s3000_s2 + $0x100] sm:$0xff]  ;;  %v73_v10 = vld [vmem:[%s3000_s2 + $0x108] sm:$0xff]  ;;  %1421 = vmatprep.subr.bf16.mxu0 %v176_v3  ;;  %v91_v15 = vld [vmem:[%s3000_s2 + $0x198] sm:$0xff] }
  0x13   :  { %v184_v12 = vpack.c.bf16 %v73_v10, %v72_v9  ;;  %1443 = vmatprep.subr.bf16.mxu1 %v192_v7  ;;  %v193_v17 = vpack.c.bf16 %v91_v15, %v90_v14  ;;  %v42_v18 = vld [vmem:[%s3000_s2 + $0x10] sm:$0xff]  ;;  %v43_v19 = vld [vmem:[%s3000_s2 + $0x18] sm:$0xff]  ;;  %v60_v23 = vld [vmem:[%s3000_s2 + $0xa0] sm:$0xff] }
  0x14   :  { %1422 = vmatpush3.bf16.msra.mxu0 %v168_v8  ;;  %v74_v20 = vld [vmem:[%s3000_s2 + $0x110] sm:$0xff]  ;;  %v169_v21 = vpack.c.bf16 %v43_v19, %v42_v18  ;;  %v75_v22 = vld [vmem:[%s3000_s2 + $0x118] sm:$0xff]  ;;  %v61_v24 = vld [vmem:[%s3000_s2 + $0xa8] sm:$0xff] }
  0x15   :  { %1444 = vmatpush3.bf16.msra.mxu1 %v184_v12  ;;  %1423 = vmatprep.subr.bf16.mxu0 %v177_v16  ;;  %v185_v25 = vpack.c.bf16 %v75_v22, %v74_v20  ;;  %v178_v26 = vpack.c.bf16 %v61_v24, %v60_v23  ;;  %v92_v27 = vld [vmem:[%s3000_s2 + $0x1a0] sm:$0xff]  ;;  %v93_v28 = vld [vmem:[%s3000_s2 + $0x1a8] sm:$0xff]  ;;  %v62_v35 = vld [vmem:[%s3000_s2 + $0xb0] sm:$0xff] }
  0x16   :  { %1445 = vmatprep.subr.bf16.mxu1 %v193_v17  ;;  %v44_v29 = vld [vmem:[%s3000_s2 + $0x20] sm:$0xff]  ;;  %v194_v30 = vpack.c.bf16 %v93_v28, %v92_v27  ;;  %v45_v31 = vld [vmem:[%s3000_s2 + $0x28] sm:$0xff]  ;;  %v63_v36 = vld [vmem:[%s3000_s2 + $0xb8] sm:$0xff] }
  0x17   :  { %v76_v32 = vld [vmem:[%s3000_s2 + $0x120] sm:$0xff]  ;;  %v77_v33 = vld [vmem:[%s3000_s2 + $0x128] sm:$0xff]  ;;  %v170_v34 = vpack.c.bf16 %v45_v31, %v44_v29  ;;  %v94_v37 = vld [vmem:[%s3000_s2 + $0x1b0] sm:$0xff]  ;;  %v179_v39 = vpack.c.bf16 %v63_v36, %v62_v35 }
  0x18   :  { %1424 = vmatpush3.bf16.msra.mxu0 %v169_v21  ;;  %v186_v38 = vpack.c.bf16 %v77_v33, %v76_v32  ;;  %v95_v40 = vld [vmem:[%s3000_s2 + $0x1b8] sm:$0xff]  ;;  %v46_v41 = vld [vmem:[%s3000_s2 + $0x30] sm:$0xff]  ;;  %v64_v46 = vld [vmem:[%s3000_s2 + $0xc0] sm:$0xff] }
  0x19   :  { %1446 = vmatpush3.bf16.msra.mxu1 %v185_v25  ;;  %1425 = vmatprep.subr.bf16.mxu0 %v178_v26  ;;  %v47_v42 = vld [vmem:[%s3000_s2 + $0x38] sm:$0xff]  ;;  %v195_v43 = vpack.c.bf16 %v95_v40, %v94_v37  ;;  %v78_v44 = vld [vmem:[%s3000_s2 + $0x130] sm:$0xff]  ;;  %v65_v47 = vld [vmem:[%s3000_s2 + $0xc8] sm:$0xff] }
  0x1a   :  { %1447 = vmatprep.subr.bf16.mxu1 %v194_v30  ;;  %v79_v45 = vld [vmem:[%s3000_s2 + $0x138] sm:$0xff]  ;;  %v96_v48 = vld [vmem:[%s3000_s2 + $0x1c0] sm:$0xff]  ;;  %v97_v49 = vld [vmem:[%s3000_s2 + $0x1c8] sm:$0xff]  ;;  %v171_v50 = vpack.c.bf16 %v47_v42, %v46_v41  ;;  %v180_v52 = vpack.c.bf16 %v65_v47, %v64_v46 }
  0x1b   :  { %v187_v51 = vpack.c.bf16 %v79_v45, %v78_v44  ;;  %v48_v53 = vld [vmem:[%s3000_s2 + $0x40] sm:$0xff]  ;;  %v49_v54 = vld [vmem:[%s3000_s2 + $0x48] sm:$0xff]  ;;  %v196_v56 = vpack.c.bf16 %v97_v49, %v96_v48  ;;  %v66_v58 = vld [vmem:[%s3000_s2 + $0xd0] sm:$0xff] }
  0x1c   :  { %1426 = vmatpush3.bf16.msra.mxu0 %v170_v34  ;;  %v80_v55 = vld [vmem:[%s3000_s2 + $0x140] sm:$0xff]  ;;  %v81_v57 = vld [vmem:[%s3000_s2 + $0x148] sm:$0xff]  ;;  %v67_v59 = vld [vmem:[%s3000_s2 + $0xd8] sm:$0xff]  ;;  %v172_v62 = vpack.c.bf16 %v49_v54, %v48_v53 }
  0x1d   :  { %1448 = vmatpush3.bf16.msra.mxu1 %v186_v38  ;;  %1427 = vmatprep.subr.bf16.mxu0 %v179_v39  ;;  %v98_v60 = vld [vmem:[%s3000_s2 + $0x1d0] sm:$0xff]  ;;  %v99_v61 = vld [vmem:[%s3000_s2 + $0x1d8] sm:$0xff]  ;;  %v188_v63 = vpack.c.bf16 %v81_v57, %v80_v55  ;;  %v181_v0 = vpack.c.bf16 %v67_v59, %v66_v58  ;;  %v68_v6 = vld [vmem:[%s3000_s2 + $0xe0] sm:$0xff] }
  0x1e   :  { %1449 = vmatprep.subr.bf16.mxu1 %v195_v43  ;;  %v50_v1 = vld [vmem:[%s3000_s2 + $0x50] sm:$0xff]  ;;  %v51_v2 = vld [vmem:[%s3000_s2 + $0x58] sm:$0xff]  ;;  %v197_v4 = vpack.c.bf16 %v99_v61, %v98_v60  ;;  %v69_v7 = vld [vmem:[%s3000_s2 + $0xe8] sm:$0xff] }
  0x1f   :  { %v82_v3 = vld [vmem:[%s3000_s2 + $0x150] sm:$0xff]  ;;  %v83_v5 = vld [vmem:[%s3000_s2 + $0x158] sm:$0xff]  ;;  %v100_v8 = vld [vmem:[%s3000_s2 + $0x1e0] sm:$0xff]  ;;  %v173_v10 = vpack.c.bf16 %v51_v2, %v50_v1  ;;  %v182_v14 = vpack.c.bf16 %v69_v7, %v68_v6 }
  0x20   :  { %1428 = vmatpush3.bf16.msra.mxu0 %v171_v50  ;;  %v101_v9 = vld [vmem:[%s3000_s2 + $0x1e8] sm:$0xff]  ;;  %v52_v11 = vld [vmem:[%s3000_s2 + $0x60] sm:$0xff]  ;;  %v189_v13 = vpack.c.bf16 %v83_v5, %v82_v3  ;;  %v26_v17 = vld [vmem:[%s2999_s1 + $0x18] sm:$0xff] }
  0x21   :  { %1450 = vmatpush3.bf16.msra.mxu1 %v187_v51  ;;  %1429 = vmatprep.subr.bf16.mxu0 %v180_v52  ;;  %v53_v12 = vld [vmem:[%s3000_s2 + $0x68] sm:$0xff]  ;;  %v84_v15 = vld [vmem:[%s3000_s2 + $0x160] sm:$0xff]  ;;  %v198_v18 = vpack.c.bf16 %v101_v9, %v100_v8  ;;  %v70_v20 = vld [vmem:[%s3000_s2 + $0xf0] sm:$0xff]  ;;  %v1937_v23 = vpack.c.bf16 %v26_v17, %v26_v17 }
  0x22   :  { %1451 = vmatprep.subr.bf16.mxu1 %v196_v56  ;;  %v24_v16 = vld [vmem:[%s2999_s1 + $0x8] sm:$0xff]  ;;  %v71_v21 = vld [vmem:[%s3000_s2 + $0xf8] sm:$0xff]  ;;  %v102_v24 = vld [vmem:[%s3000_s2 + $0x1f0] sm:$0xff]  ;;  %v174_v26 = vpack.c.bf16 %v53_v12, %v52_v11 }
  0x23   :  { %v85_v19 = vld [vmem:[%s3000_s2 + $0x168] sm:$0xff]  ;;  %v1935_v22 = vpack.c.bf16 %v24_v16, %v24_v16  ;;  %v103_v25 = vld [vmem:[%s3000_s2 + $0x1f8] sm:$0xff]  ;;  %v183_v28 = vpack.c.bf16 %v71_v21, %v70_v20  ;;  %v54_v29 = vld [vmem:[%s3000_s2 + $0x70] sm:$0xff]  ;;  %304 = vmatprep.mubr.bf16.mxu1 %v1937_v23 }
  0x24   :  { %1430 = vmatpush3.bf16.msra.mxu0 %v172_v62  ;;  %v190_v27 = vpack.c.bf16 %v85_v19, %v84_v15  ;;  %v55_v30 = vld [vmem:[%s3000_s2 + $0x78] sm:$0xff]  ;;  %v86_v31 = vld [vmem:[%s3000_s2 + $0x170] sm:$0xff]  ;;  %v199_v32 = vpack.c.bf16 %v103_v25, %v102_v24  ;;  %v120_v34 = vld [vmem:[%s3000_s2 + $0x280] sm:$0xff] }
  0x25   :  { %1452 = vmatpush3.bf16.msra.mxu1 %v188_v63  ;;  %1431 = vmatprep.subr.bf16.mxu0 %v181_v0  ;;  %v87_v33 = vld [vmem:[%s3000_s2 + $0x178] sm:$0xff]  ;;  %v121_v35 = vld [vmem:[%s3000_s2 + $0x288] sm:$0xff]  ;;  %v152_v36 = vld [vmem:[%s3000_s2 + $0x380] sm:$0xff]  ;;  %v175_v38 = vpack.c.bf16 %v55_v30, %v54_v29 }
  0x26   :  { %1453 = vmatprep.subr.bf16.mxu1 %v197_v4  ;;  %264 = vmatprep.mubr.bf16.mxu0 %v1935_v22  ;;  %v153_v37 = vld [vmem:[%s3000_s2 + $0x388] sm:$0xff]  ;;  %v23_v39 = vld [vmem:[%s2999_s1] sm:$0xff]  ;;  %v25_v40 = vld [vmem:[%s2999_s1 + $0x10] sm:$0xff]  ;;  %v191_v41 = vpack.c.bf16 %v87_v33, %v86_v31  ;;  %v208_v42 = vpack.c.bf16 %v121_v35, %v120_v34 }
  0x27   :  { %v104_v43 = vld [vmem:[%s3000_s2 + $0x200] sm:$0xff]  ;;  %v105_v44 = vld [vmem:[%s3000_s2 + $0x208] sm:$0xff]  ;;  %v224_v46 = vpack.c.bf16 %v153_v37, %v152_v36  ;;  %v122_v48 = vld [vmem:[%s3000_s2 + $0x290] sm:$0xff]  ;;  %v1995_v50 = vpack.c.bf16 %v23_v39, %v23_v39  ;;  %v2003_v53 = vpack.c.bf16 %v25_v40, %v25_v40 }
  0x28   :  { %1432 = vmatpush3.bf16.msra.mxu0 %v173_v10  ;;  %v136_v45 = vld [vmem:[%s3000_s2 + $0x300] sm:$0xff]  ;;  %v137_v47 = vld [vmem:[%s3000_s2 + $0x308] sm:$0xff]  ;;  %v123_v49 = vld [vmem:[%s3000_s2 + $0x298] sm:$0xff]  ;;  %v200_v54 = vpack.c.bf16 %v105_v44, %v104_v43 }
  0x29   :  { %1454 = vmatpush3.bf16.msra.mxu1 %v189_v13  ;;  %1433 = vmatprep.subr.bf16.mxu0 %v182_v14  ;;  %v154_v51 = vld [vmem:[%s3000_s2 + $0x390] sm:$0xff]  ;;  %v155_v52 = vld [vmem:[%s3000_s2 + $0x398] sm:$0xff]  ;;  %v216_v55 = vpack.c.bf16 %v137_v47, %v136_v45  ;;  %v209_v56 = vpack.c.bf16 %v123_v49, %v122_v48  ;;  %v124_v62 = vld [vmem:[%s3000_s2 + $0x2a0] sm:$0xff] }
  0x2a   :  { %1455 = vmatprep.subr.bf16.mxu1 %v198_v18  ;;  %v106_v57 = vld [vmem:[%s3000_s2 + $0x210] sm:$0xff]  ;;  %v107_v58 = vld [vmem:[%s3000_s2 + $0x218] sm:$0xff]  ;;  %v225_v60 = vpack.c.bf16 %v155_v52, %v154_v51  ;;  %v125_v63 = vld [vmem:[%s3000_s2 + $0x2a8] sm:$0xff] }
  0x2b   :  { %v138_v59 = vld [vmem:[%s3000_s2 + $0x310] sm:$0xff]  ;;  %v139_v61 = vld [vmem:[%s3000_s2 + $0x318] sm:$0xff]  ;;  %v156_v0 = vld [vmem:[%s3000_s2 + $0x3a0] sm:$0xff]  ;;  %v201_v2 = vpack.c.bf16 %v107_v58, %v106_v57  ;;  %v210_v4 = vpack.c.bf16 %v125_v63, %v124_v62 }
  0x2c   :  { %1434 = vmatpush3.bf16.msra.mxu0 %v174_v26  ;;  %v157_v1 = vld [vmem:[%s3000_s2 + $0x3a8] sm:$0xff]  ;;  %v217_v3 = vpack.c.bf16 %v139_v61, %v138_v59  ;;  %v108_v5 = vld [vmem:[%s3000_s2 + $0x220] sm:$0xff]  ;;  %v126_v10 = vld [vmem:[%s3000_s2 + $0x2b0] sm:$0xff] }
  0x2d   :  { %1456 = vmatpush3.bf16.msra.mxu1 %v190_v27  ;;  %1435 = vmatprep.subr.bf16.mxu0 %v183_v28  ;;  %v109_v6 = vld [vmem:[%s3000_s2 + $0x228] sm:$0xff]  ;;  %v140_v7 = vld [vmem:[%s3000_s2 + $0x320] sm:$0xff]  ;;  %v226_v8 = vpack.c.bf16 %v157_v1, %v156_v0  ;;  %v127_v11 = vld [vmem:[%s3000_s2 + $0x2b8] sm:$0xff] }
  0x2e   :  { %1457 = vmatprep.subr.bf16.mxu1 %v199_v32  ;;  %v141_v9 = vld [vmem:[%s3000_s2 + $0x328] sm:$0xff]  ;;  %v158_v12 = vld [vmem:[%s3000_s2 + $0x3b0] sm:$0xff]  ;;  %v159_v13 = vld [vmem:[%s3000_s2 + $0x3b8] sm:$0xff]  ;;  %v202_v14 = vpack.c.bf16 %v109_v6, %v108_v5  ;;  %v211_v17 = vpack.c.bf16 %v127_v11, %v126_v10 }
  0x2f   :  { %v110_v15 = vld [vmem:[%s3000_s2 + $0x230] sm:$0xff]  ;;  %v218_v16 = vpack.c.bf16 %v141_v9, %v140_v7  ;;  %v111_v18 = vld [vmem:[%s3000_s2 + $0x238] sm:$0xff]  ;;  %v227_v21 = vpack.c.bf16 %v159_v13, %v158_v12  ;;  %v128_v24 = vld [vmem:[%s3000_s2 + $0x2c0] sm:$0xff] }
  0x30   :  { %1436 = vmatpush3.bf16.msra.mxu0 %v175_v38  ;;  %v142_v19 = vld [vmem:[%s3000_s2 + $0x330] sm:$0xff]  ;;  %v143_v20 = vld [vmem:[%s3000_s2 + $0x338] sm:$0xff]  ;;  %v129_v25 = vld [vmem:[%s3000_s2 + $0x2c8] sm:$0xff]  ;;  %v203_v28 = vpack.c.bf16 %v111_v18, %v110_v15 }
  0x31   :  { %1458 = vmatpush3.bf16.msra.mxu1 %v191_v41  ;;  %1465 = vmatprep.subr.bf16.mxu0 %v208_v42  ;;  %v160_v26 = vld [vmem:[%s3000_s2 + $0x3c0] sm:$0xff]  ;;  %v161_v27 = vld [vmem:[%s3000_s2 + $0x3c8] sm:$0xff]  ;;  %v219_v29 = vpack.c.bf16 %v143_v20, %v142_v19  ;;  %v30_v31 = vld [vmem:[%s2999_s1 + $0x38] sm:$0xff]  ;;  %v212_v32 = vpack.c.bf16 %v129_v25, %v128_v24 }
  0x32   :  { %1487 = vmatprep.subr.bf16.mxu1 %v224_v46  ;;  %v28_v30 = vld [vmem:[%s2999_s1 + $0x28] sm:$0xff]  ;;  %v112_v33 = vld [vmem:[%s3000_s2 + $0x240] sm:$0xff]  ;;  %v2096_v37 = vpack.c.bf16 %v30_v31, %v30_v31  ;;  %v228_v38 = vpack.c.bf16 %v161_v27, %v160_v26  ;;  %v130_v40 = vld [vmem:[%s3000_s2 + $0x2d0] sm:$0xff] }
  0x33   :  { %265 = vmatmul.mubr.bf16.vlgmr.msra.gmra.mrb[0].mxu0 %v1995_v50  ;;  %v113_v34 = vld [vmem:[%s3000_s2 + $0x248] sm:$0xff]  ;;  %v144_v35 = vld [vmem:[%s3000_s2 + $0x340] sm:$0xff]  ;;  %v2094_v36 = vpack.c.bf16 %v28_v30, %v28_v30  ;;  %v131_v41 = vld [vmem:[%s3000_s2 + $0x2d8] sm:$0xff] }
  0x34   :  { %305 = vmatmul.mubr.bf16.vlgmr.msra.gmra.mrb[0].mxu1 %v2003_v53  ;;  %1466 = vmatpush3.bf16.msra.mxu0 %v200_v54  ;;  %v145_v39 = vld [vmem:[%s3000_s2 + $0x348] sm:$0xff]  ;;  %v162_v42 = vld [vmem:[%s3000_s2 + $0x3d0] sm:$0xff]  ;;  %v163_v43 = vld [vmem:[%s3000_s2 + $0x3d8] sm:$0xff]  ;;  %v204_v44 = vpack.c.bf16 %v113_v34, %v112_v33  ;;  %v213_v46 = vpack.c.bf16 %v131_v41, %v130_v40 }
  0x35   :  { %1488 = vmatpush3.bf16.msra.mxu1 %v216_v55  ;;  %1467 = vmatprep.subr.bf16.mxu0 %v209_v56  ;;  %v220_v45 = vpack.c.bf16 %v145_v39, %v144_v35  ;;  %v114_v47 = vld [vmem:[%s3000_s2 + $0x250] sm:$0xff]  ;;  %v115_v48 = vld [vmem:[%s3000_s2 + $0x258] sm:$0xff]  ;;  %v229_v51 = vpack.c.bf16 %v163_v43, %v162_v42  ;;  %v132_v54 = vld [vmem:[%s3000_s2 + $0x2e0] sm:$0xff] }
  0x36   :  { %1489 = vmatprep.subr.bf16.mxu1 %v225_v60  ;;  %344 = vmatprep.mubr.bf16.mxu0 %v2094_v36  ;;  %v146_v49 = vld [vmem:[%s3000_s2 + $0x350] sm:$0xff]  ;;  %v147_v52 = vld [vmem:[%s3000_s2 + $0x358] sm:$0xff]  ;;  %v133_v55 = vld [vmem:[%s3000_s2 + $0x2e8] sm:$0xff]  ;;  %v205_v58 = vpack.c.bf16 %v115_v48, %v114_v47 }
  0x37   :  { %384 = vmatprep.mubr.bf16.mxu1 %v2096_v37  ;;  %v164_v56 = vld [vmem:[%s3000_s2 + $0x3e0] sm:$0xff]  ;;  %v165_v57 = vld [vmem:[%s3000_s2 + $0x3e8] sm:$0xff]  ;;  %v221_v59 = vpack.c.bf16 %v147_v52, %v146_v49  ;;  %v214_v60 = vpack.c.bf16 %v133_v55, %v132_v54  ;;  %v167_v5 = vld [vmem:[%s3000_s2 + $0x3f8] sm:$0xff] }
  0x38   :  { %1468 = vmatpush3.bf16.msra.mxu0 %v201_v2  ;;  %v116_v61 = vld [vmem:[%s3000_s2 + $0x260] sm:$0xff]  ;;  %v117_v62 = vld [vmem:[%s3000_s2 + $0x268] sm:$0xff]  ;;  %v230_v0 = vpack.c.bf16 %v165_v57, %v164_v56  ;;  %v134_v2 = vld [vmem:[%s3000_s2 + $0x2f0] sm:$0xff] }
  0x39   :  { %1490 = vmatpush3.bf16.msra.mxu1 %v217_v3  ;;  %1469 = vmatprep.subr.bf16.mxu0 %v210_v4  ;;  %v148_v63 = vld [vmem:[%s3000_s2 + $0x360] sm:$0xff]  ;;  %v149_v1 = vld [vmem:[%s3000_s2 + $0x368] sm:$0xff]  ;;  %v135_v3 = vld [vmem:[%s3000_s2 + $0x2f8] sm:$0xff]  ;;  %v206_v6 = vpack.c.bf16 %v117_v62, %v116_v61 }
  0x3a   :  { %1491 = vmatprep.subr.bf16.mxu1 %v226_v8  ;;  %v166_v4 = vld [vmem:[%s3000_s2 + $0x3f0] sm:$0xff]  ;;  %v222_v7 = vpack.c.bf16 %v149_v1, %v148_v63  ;;  %v215_v8 = vpack.c.bf16 %v135_v3, %v134_v2  ;;  %v119_v10 = vld [vmem:[%s3000_s2 + $0x278] sm:$0xff]  ;;  %v1177_v15 = vld [vmem:[%s3000_s2 + $0x488] sm:$0xff] }
  0x3b   :  { %v118_v9 = vld [vmem:[%s3000_s2 + $0x270] sm:$0xff]  ;;  %v231_v12 = vpack.c.bf16 %v167_v5, %v166_v4  ;;  %v151_v13 = vld [vmem:[%s3000_s2 + $0x378] sm:$0xff]  ;;  %v27_v19 = vld [vmem:[%s2999_s1 + $0x20] sm:$0xff] }
  0x3c   :  { %1470 = vmatpush3.bf16.msra.mxu0 %v202_v14  ;;  %v150_v11 = vld [vmem:[%s3000_s2 + $0x370] sm:$0xff]  ;;  %v1176_v14 = vld [vmem:[%s3000_s2 + $0x480] sm:$0xff]  ;;  %v207_v18 = vpack.c.bf16 %v119_v10, %v118_v9  ;;  %v1161_v26 = vld [vmem:[%s3000_s2 + $0x408] sm:$0xff] }
  0x3d   :  { %1492 = vmatpush3.bf16.msra.mxu1 %v218_v16  ;;  %1471 = vmatprep.subr.bf16.mxu0 %v211_v17  ;;  %v1208_v16 = vld [vmem:[%s3000_s2 + $0x580] sm:$0xff]  ;;  %v1209_v17 = vld [vmem:[%s3000_s2 + $0x588] sm:$0xff]  ;;  %v29_v20 = vld [vmem:[%s2999_s1 + $0x30] sm:$0xff]  ;;  %v532_v24 = vpack.c.bf16 %v1177_v15, %v1176_v14 }
  0x3e   :  { %1493 = vmatprep.subr.bf16.mxu1 %v227_v21  ;;  %v223_v21 = vpack.c.bf16 %v151_v13, %v150_v11  ;;  %v1160_v25 = vld [vmem:[%s3000_s2 + $0x400] sm:$0xff]  ;;  %v1178_v30 = vld [vmem:[%s3000_s2 + $0x490] sm:$0xff]  ;;  %v1179_v31 = vld [vmem:[%s3000_s2 + $0x498] sm:$0xff]  ;;  %v2219_v35 = vpack.c.bf16 %v29_v20, %v29_v20 }
  0x3f   :  { %v1192_v27 = vld [vmem:[%s3000_s2 + $0x500] sm:$0xff]  ;;  %v1210_v33 = vld [vmem:[%s3000_s2 + $0x590] sm:$0xff]  ;;  %v1211_v34 = vld [vmem:[%s3000_s2 + $0x598] sm:$0xff]  ;;  %v533_v40 = vpack.c.bf16 %v1179_v31, %v1178_v30 }
  0x40   :  { %1472 = vmatpush3.bf16.msra.mxu0 %v203_v28  ;;  %v548_v28 = vpack.c.bf16 %v1209_v17, %v1208_v16  ;;  %v1162_v41 = vld [vmem:[%s3000_s2 + $0x410] sm:$0xff]  ;;  %v1163_v42 = vld [vmem:[%s3000_s2 + $0x418] sm:$0xff]  ;;  %v1181_v47 = vld [vmem:[%s3000_s2 + $0x4a8] sm:$0xff] }
  0x41   :  { %1494 = vmatpush3.bf16.msra.mxu1 %v219_v29  ;;  %1473 = vmatprep.subr.bf16.mxu0 %v212_v32  ;;  %v1193_v29 = vld [vmem:[%s3000_s2 + $0x508] sm:$0xff]  ;;  %v2211_v32 = vpack.c.bf16 %v27_v19, %v27_v19  ;;  %v1194_v43 = vld [vmem:[%s3000_s2 + $0x510] sm:$0xff]  ;;  %v1212_v48 = vld [vmem:[%s3000_s2 + $0x5a0] sm:$0xff] }
  0x42   :  { %1495 = vmatprep.subr.bf16.mxu1 %v228_v38  ;;  %v524_v38 = vpack.c.bf16 %v1161_v26, %v1160_v25  ;;  %v540_v39 = vpack.c.bf16 %v1193_v29, %v1192_v27  ;;  %v1213_v49 = vld [vmem:[%s3000_s2 + $0x5a8] sm:$0xff]  ;;  %v1164_v55 = vld [vmem:[%s3000_s2 + $0x420] sm:$0xff]  ;;  %v1183_v61 = vld [vmem:[%s3000_s2 + $0x4b8] sm:$0xff] }
  0x43   :  { %v1165_v56 = vld [vmem:[%s3000_s2 + $0x428] sm:$0xff]  ;;  %v1196_v57 = vld [vmem:[%s3000_s2 + $0x520] sm:$0xff]  ;;  %v1214_v62 = vld [vmem:[%s3000_s2 + $0x5b0] sm:$0xff] }
  0x44   :  { %1474 = vmatpush3.bf16.msra.mxu0 %v204_v44  ;;  %v549_v44 = vpack.c.bf16 %v1211_v34, %v1210_v33  ;;  %v1215_v63 = vld [vmem:[%s3000_s2 + $0x5b8] sm:$0xff]  ;;  %v1166_v3 = vld [vmem:[%s3000_s2 + $0x430] sm:$0xff]  ;;  %v1185_v9 = vld [vmem:[%s3000_s2 + $0x4c8] sm:$0xff] }
  0x45   :  { %1496 = vmatpush3.bf16.msra.mxu1 %v220_v45  ;;  %1475 = vmatprep.subr.bf16.mxu0 %v213_v46  ;;  %v1195_v45 = vld [vmem:[%s3000_s2 + $0x518] sm:$0xff]  ;;  %v1180_v46 = vld [vmem:[%s3000_s2 + $0x4a0] sm:$0xff]  ;;  %v1198_v5 = vld [vmem:[%s3000_s2 + $0x530] sm:$0xff] }
  0x46   :  { %1497 = vmatprep.subr.bf16.mxu1 %v229_v51  ;;  %v525_v51 = vpack.c.bf16 %v1163_v42, %v1162_v41  ;;  %v541_v52 = vpack.c.bf16 %v1195_v45, %v1194_v43  ;;  %v534_v54 = vpack.c.bf16 %v1181_v47, %v1180_v46  ;;  %v1167_v4 = vld [vmem:[%s3000_s2 + $0x438] sm:$0xff]  ;;  %v1216_v10 = vld [vmem:[%s3000_s2 + $0x5c0] sm:$0xff]  ;;  %v1217_v11 = vld [vmem:[%s3000_s2 + $0x5c8] sm:$0xff] }
  0x47   :  { %v1168_v15 = vld [vmem:[%s3000_s2 + $0x440] sm:$0xff]  ;;  %v1169_v16 = vld [vmem:[%s3000_s2 + $0x448] sm:$0xff]  ;;  %v1186_v20 = vld [vmem:[%s3000_s2 + $0x4d0] sm:$0xff] }
  0x48   :  { %1476 = vmatpush3.bf16.msra.mxu0 %v205_v58  ;;  %v550_v58 = vpack.c.bf16 %v1213_v49, %v1212_v48  ;;  %v1200_v17 = vld [vmem:[%s3000_s2 + $0x540] sm:$0xff]  ;;  %v1201_v19 = vld [vmem:[%s3000_s2 + $0x548] sm:$0xff]  ;;  %v1219_v25 = vld [vmem:[%s3000_s2 + $0x5d8] sm:$0xff]  ;;  %v528_v26 = vpack.c.bf16 %v1169_v16, %v1168_v15 }
  0x49   :  { %1498 = vmatpush3.bf16.msra.mxu1 %v221_v59  ;;  %1477 = vmatprep.subr.bf16.mxu0 %v214_v60  ;;  %v1197_v59 = vld [vmem:[%s3000_s2 + $0x528] sm:$0xff]  ;;  %v1182_v60 = vld [vmem:[%s3000_s2 + $0x4b0] sm:$0xff]  ;;  %v544_v27 = vpack.c.bf16 %v1201_v19, %v1200_v17  ;;  %v1171_v30 = vld [vmem:[%s3000_s2 + $0x458] sm:$0xff] }
  0x4a   :  { %1499 = vmatprep.subr.bf16.mxu1 %v230_v0  ;;  %v526_v0 = vpack.c.bf16 %v1165_v56, %v1164_v55  ;;  %v542_v1 = vpack.c.bf16 %v1197_v59, %v1196_v57  ;;  %v535_v2 = vpack.c.bf16 %v1183_v61, %v1182_v60  ;;  %v1170_v29 = vld [vmem:[%s3000_s2 + $0x450] sm:$0xff]  ;;  %v1203_v34 = vld [vmem:[%s3000_s2 + $0x558] sm:$0xff]  ;;  %v1221_v41 = vld [vmem:[%s3000_s2 + $0x5e8] sm:$0xff] }
  0x4b   :  { %v1202_v31 = vld [vmem:[%s3000_s2 + $0x550] sm:$0xff]  ;;  %v529_v42 = vpack.c.bf16 %v1171_v30, %v1170_v29  ;;  %v1172_v45 = vld [vmem:[%s3000_s2 + $0x460] sm:$0xff]  ;;  %v1173_v46 = vld [vmem:[%s3000_s2 + $0x468] sm:$0xff] }
  0x4c   :  { %1478 = vmatpush3.bf16.msra.mxu0 %v206_v6  ;;  %v551_v6 = vpack.c.bf16 %v1215_v63, %v1214_v62  ;;  %v545_v43 = vpack.c.bf16 %v1203_v34, %v1202_v31  ;;  %v1204_v47 = vld [vmem:[%s3000_s2 + $0x560] sm:$0xff]  ;;  %v1205_v49 = vld [vmem:[%s3000_s2 + $0x568] sm:$0xff]  ;;  %v1223_v55 = vld [vmem:[%s3000_s2 + $0x5f8] sm:$0xff]  ;;  %v530_v56 = vpack.c.bf16 %v1173_v46, %v1172_v45 }
  0x4d   :  { %1500 = vmatpush3.bf16.msra.mxu1 %v222_v7  ;;  %1479 = vmatprep.subr.bf16.mxu0 %v215_v8  ;;  %v1199_v7 = vld [vmem:[%s3000_s2 + $0x538] sm:$0xff]  ;;  %v1184_v8 = vld [vmem:[%s3000_s2 + $0x4c0] sm:$0xff]  ;;  %v546_v57 = vpack.c.bf16 %v1205_v49, %v1204_v47  ;;  %v1174_v59 = vld [vmem:[%s3000_s2 + $0x470] sm:$0xff] }
  0x4e   :  { %1501 = vmatprep.subr.bf16.mxu1 %v231_v12  ;;  %v527_v12 = vpack.c.bf16 %v1167_v4, %v1166_v3  ;;  %v543_v13 = vpack.c.bf16 %v1199_v7, %v1198_v5  ;;  %v536_v14 = vpack.c.bf16 %v1185_v9, %v1184_v8  ;;  %v1175_v60 = vld [vmem:[%s3000_s2 + $0x478] sm:$0xff]  ;;  %v1206_v61 = vld [vmem:[%s3000_s2 + $0x570] sm:$0xff]  ;;  %v1273_v3 = vld [vmem:[%s3000_s2 + $0x788] sm:$0xff] }
  0x4f   :  { %v1207_v63 = vld [vmem:[%s3000_s2 + $0x578] sm:$0xff]  ;;  %v531_v4 = vpack.c.bf16 %v1175_v60, %v1174_v59  ;;  %v1224_v7 = vld [vmem:[%s3000_s2 + $0x600] sm:$0xff]  ;;  %v1225_v8 = vld [vmem:[%s3000_s2 + $0x608] sm:$0xff] }
  0x50   :  { %1480 = vmatpush3.bf16.msra.mxu0 %v207_v18  ;;  %v552_v18 = vpack.c.bf16 %v1217_v11, %v1216_v10  ;;  %v547_v5 = vpack.c.bf16 %v1207_v63, %v1206_v61  ;;  %v1256_v9 = vld [vmem:[%s3000_s2 + $0x700] sm:$0xff]  ;;  %v1257_v11 = vld [vmem:[%s3000_s2 + $0x708] sm:$0xff]  ;;  %v1275_v15 = vld [vmem:[%s3000_s2 + $0x798] sm:$0xff]  ;;  %v556_v16 = vpack.c.bf16 %v1225_v8, %v1224_v7 }
  0x51   :  { %1502 = vmatpush3.bf16.msra.mxu1 %v223_v21  ;;  %1509 = vmatprep.subr.bf16.mxu0 %v532_v24  ;;  %v1187_v21 = vld [vmem:[%s3000_s2 + $0x4d8] sm:$0xff]  ;;  %v1218_v24 = vld [vmem:[%s3000_s2 + $0x5d0] sm:$0xff]  ;;  %v572_v17 = vpack.c.bf16 %v1257_v11, %v1256_v9  ;;  %v1277_v29 = vld [vmem:[%s3000_s2 + $0x7a8] sm:$0xff] }
  0x52   :  { %1531 = vmatprep.subr.bf16.mxu1 %v548_v28  ;;  %v537_v28 = vpack.c.bf16 %v1187_v21, %v1186_v20  ;;  %v553_v33 = vpack.c.bf16 %v1219_v25, %v1218_v24  ;;  %v1226_v19 = vld [vmem:[%s3000_s2 + $0x610] sm:$0xff]  ;;  %v1227_v20 = vld [vmem:[%s3000_s2 + $0x618] sm:$0xff]  ;;  %v1228_v34 = vld [vmem:[%s3000_s2 + $0x620] sm:$0xff] }
  0x53   :  { %345 = vmatmul.mubr.bf16.vlgmr.msra.gmra.mrb[4].mxu0 %v2211_v32  ;;  %v1258_v21 = vld [vmem:[%s3000_s2 + $0x710] sm:$0xff]  ;;  %v1259_v25 = vld [vmem:[%s3000_s2 + $0x718] sm:$0xff]  ;;  %v557_v30 = vpack.c.bf16 %v1227_v20, %v1226_v19  ;;  %v1281_v59 = vld [vmem:[%s3000_s2 + $0x7c8] sm:$0xff] }
  0x54   :  { %385 = vmatmul.mubr.bf16.vlgmr.msra.gmra.mrb[4].mxu1 %v2219_v35  ;;  %1510 = vmatpush3.bf16.msra.mxu0 %v524_v38  ;;  %v1188_v38 = vld [vmem:[%s3000_s2 + $0x4e0] sm:$0xff]  ;;  %v573_v31 = vpack.c.bf16 %v1259_v25, %v1258_v21  ;;  %v1279_v45 = vld [vmem:[%s3000_s2 + $0x7b8] sm:$0xff]  ;;  %v1230_v49 = vld [vmem:[%s3000_s2 + $0x630] sm:$0xff] }
  0x55   :  { %1532 = vmatpush3.bf16.msra.mxu1 %v540_v39  ;;  %1511 = vmatprep.subr.bf16.mxu0 %v533_v40  ;;  %v1189_v39 = vld [vmem:[%s3000_s2 + $0x4e8] sm:$0xff]  ;;  %v1220_v40 = vld [vmem:[%s3000_s2 + $0x5e0] sm:$0xff]  ;;  %v1283_v7 = vld [vmem:[%s3000_s2 + $0x7d8] sm:$0xff] }
  0x56   :  { %1533 = vmatprep.subr.bf16.mxu1 %v549_v44  ;;  %620 = vmatprep.mubr.bf16.mxu0 %v1935_v22  ;;  %v538_v44 = vpack.c.bf16 %v1189_v39, %v1188_v38  ;;  %v554_v48 = vpack.c.bf16 %v1221_v41, %v1220_v40  ;;  %v1229_v38 = vld [vmem:[%s3000_s2 + $0x628] sm:$0xff]  ;;  %v1260_v39 = vld [vmem:[%s3000_s2 + $0x720] sm:$0xff]  ;;  %v1234_v11 = vld [vmem:[%s3000_s2 + $0x650] sm:$0xff] }
  0x57   :  { %660 = vmatprep.mubr.bf16.mxu1 %v1937_v23  ;;  %v1261_v41 = vld [vmem:[%s3000_s2 + $0x728] sm:$0xff]  ;;  %v558_v46 = vpack.c.bf16 %v1229_v38, %v1228_v34  ;;  %v1232_v63 = vld [vmem:[%s3000_s2 + $0x640] sm:$0xff]  ;;  %v1287_v34 = vld [vmem:[%s3000_s2 + $0x7f8] sm:$0xff] }
  0x58   :  { %1512 = vmatpush3.bf16.msra.mxu0 %v525_v51  ;;  %v1190_v51 = vld [vmem:[%s3000_s2 + $0x4f0] sm:$0xff]  ;;  %v574_v47 = vpack.c.bf16 %v1261_v41, %v1260_v39  ;;  %v1285_v19 = vld [vmem:[%s3000_s2 + $0x7e8] sm:$0xff]  ;;  %v1236_v25 = vld [vmem:[%s3000_s2 + $0x660] sm:$0xff] }
  0x59   :  { %1534 = vmatpush3.bf16.msra.mxu1 %v541_v52  ;;  %1513 = vmatprep.subr.bf16.mxu0 %v534_v54  ;;  %v1191_v52 = vld [vmem:[%s3000_s2 + $0x4f8] sm:$0xff]  ;;  %v1222_v54 = vld [vmem:[%s3000_s2 + $0x5f0] sm:$0xff] }
  0x5a   :  { %1535 = vmatprep.subr.bf16.mxu1 %v550_v58  ;;  %v539_v58 = vpack.c.bf16 %v1191_v52, %v1190_v51  ;;  %v555_v62 = vpack.c.bf16 %v1223_v55, %v1222_v54  ;;  %v1231_v51 = vld [vmem:[%s3000_s2 + $0x638] sm:$0xff]  ;;  %v1262_v52 = vld [vmem:[%s3000_s2 + $0x730] sm:$0xff] }
  0x5b   :  { %v1263_v55 = vld [vmem:[%s3000_s2 + $0x738] sm:$0xff]  ;;  %v559_v60 = vpack.c.bf16 %v1231_v51, %v1230_v49  ;;  %v1238_v41 = vld [vmem:[%s3000_s2 + $0x670] sm:$0xff]  ;;  %v1338_v49 = vld [vmem:[%s3000_s2 + $0x988] sm:$0xff] }
  0x5c   :  { %1514 = vmatpush3.bf16.msra.mxu0 %v526_v0  ;;  %v1240_v0 = vld [vmem:[%s3000_s2 + $0x680] sm:$0xff]  ;;  %v575_v61 = vpack.c.bf16 %v1263_v55, %v1262_v52 }
  0x5d   :  { %1536 = vmatpush3.bf16.msra.mxu1 %v542_v1  ;;  %1515 = vmatprep.subr.bf16.mxu0 %v535_v2  ;;  %v1241_v1 = vld [vmem:[%s3000_s2 + $0x688] sm:$0xff]  ;;  %v1272_v2 = vld [vmem:[%s3000_s2 + $0x780] sm:$0xff] }
  0x5e   :  { %1537 = vmatprep.subr.bf16.mxu1 %v551_v6  ;;  %v564_v6 = vpack.c.bf16 %v1241_v1, %v1240_v0  ;;  %v580_v10 = vpack.c.bf16 %v1273_v3, %v1272_v2  ;;  %v1233_v0 = vld [vmem:[%s3000_s2 + $0x648] sm:$0xff]  ;;  %v1264_v1 = vld [vmem:[%s3000_s2 + $0x740] sm:$0xff] }
  0x5f   :  { %v1265_v3 = vld [vmem:[%s3000_s2 + $0x748] sm:$0xff]  ;;  %v560_v8 = vpack.c.bf16 %v1233_v0, %v1232_v63  ;;  %v1289_v55 = vld [vmem:[%s3000_s2 + $0x800] sm:$0xff]  ;;  %v1340_v63 = vld [vmem:[%s3000_s2 + $0x998] sm:$0xff] }
  0x60   :  { %1516 = vmatpush3.bf16.msra.mxu0 %v527_v12  ;;  %v1242_v12 = vld [vmem:[%s3000_s2 + $0x690] sm:$0xff]  ;;  %v576_v9 = vpack.c.bf16 %v1265_v3, %v1264_v1 }
  0x61   :  { %1538 = vmatpush3.bf16.msra.mxu1 %v543_v13  ;;  %1517 = vmatprep.subr.bf16.mxu0 %v536_v14  ;;  %v1243_v13 = vld [vmem:[%s3000_s2 + $0x698] sm:$0xff]  ;;  %v1274_v14 = vld [vmem:[%s3000_s2 + $0x790] sm:$0xff] }
  0x62   :  { %1539 = vmatprep.subr.bf16.mxu1 %v552_v18  ;;  %v565_v18 = vpack.c.bf16 %v1243_v13, %v1242_v12  ;;  %v581_v24 = vpack.c.bf16 %v1275_v15, %v1274_v14  ;;  %v1235_v12 = vld [vmem:[%s3000_s2 + $0x658] sm:$0xff]  ;;  %v1266_v13 = vld [vmem:[%s3000_s2 + $0x750] sm:$0xff] }
  0x63   :  { %v1267_v15 = vld [vmem:[%s3000_s2 + $0x758] sm:$0xff]  ;;  %v561_v20 = vpack.c.bf16 %v1235_v12, %v1234_v11  ;;  %v1291_v1 = vld [vmem:[%s3000_s2 + $0x810] sm:$0xff] }
  0x64   :  { %1518 = vmatpush3.bf16.msra.mxu0 %v528_v26  ;;  %v1244_v26 = vld [vmem:[%s3000_s2 + $0x6a0] sm:$0xff]  ;;  %v577_v21 = vpack.c.bf16 %v1267_v15, %v1266_v13 }
  0x65   :  { %1540 = vmatpush3.bf16.msra.mxu1 %v544_v27  ;;  %1519 = vmatprep.subr.bf16.mxu0 %v537_v28  ;;  %v1245_v27 = vld [vmem:[%s3000_s2 + $0x6a8] sm:$0xff]  ;;  %v1276_v28 = vld [vmem:[%s3000_s2 + $0x7a0] sm:$0xff] }
  0x66   :  { %1541 = vmatprep.subr.bf16.mxu1 %v553_v33  ;;  %v566_v33 = vpack.c.bf16 %v1245_v27, %v1244_v26  ;;  %v582_v40 = vpack.c.bf16 %v1277_v29, %v1276_v28  ;;  %v1237_v26 = vld [vmem:[%s3000_s2 + $0x668] sm:$0xff]  ;;  %v1268_v27 = vld [vmem:[%s3000_s2 + $0x760] sm:$0xff] }
  0x67   :  { %v1269_v29 = vld [vmem:[%s3000_s2 + $0x768] sm:$0xff]  ;;  %v562_v38 = vpack.c.bf16 %v1237_v26, %v1236_v25 }
  0x68   :  { %1520 = vmatpush3.bf16.msra.mxu0 %v529_v42  ;;  %v1246_v42 = vld [vmem:[%s3000_s2 + $0x6b0] sm:$0xff]  ;;  %v578_v39 = vpack.c.bf16 %v1269_v29, %v1268_v27 }
  0x69   :  { %1542 = vmatpush3.bf16.msra.mxu1 %v545_v43  ;;  %1521 = vmatprep.subr.bf16.mxu0 %v538_v44  ;;  %v1247_v43 = vld [vmem:[%s3000_s2 + $0x6b8] sm:$0xff]  ;;  %v1278_v44 = vld [vmem:[%s3000_s2 + $0x7b0] sm:$0xff] }
  0x6a   :  { %1543 = vmatprep.subr.bf16.mxu1 %v554_v48  ;;  %v567_v48 = vpack.c.bf16 %v1247_v43, %v1246_v42  ;;  %v583_v54 = vpack.c.bf16 %v1279_v45, %v1278_v44  ;;  %v1239_v42 = vld [vmem:[%s3000_s2 + $0x678] sm:$0xff]  ;;  %v1270_v43 = vld [vmem:[%s3000_s2 + $0x770] sm:$0xff] }
  0x6b   :  { %v1271_v45 = vld [vmem:[%s3000_s2 + $0x778] sm:$0xff]  ;;  %v563_v51 = vpack.c.bf16 %v1239_v42, %v1238_v41 }
  0x6c   :  { %1522 = vmatpush3.bf16.msra.mxu0 %v530_v56  ;;  %v1248_v56 = vld [vmem:[%s3000_s2 + $0x6c0] sm:$0xff]  ;;  %v579_v52 = vpack.c.bf16 %v1271_v45, %v1270_v43 }
  0x6d   :  { %1544 = vmatpush3.bf16.msra.mxu1 %v546_v57  ;;  %1523 = vmatprep.subr.bf16.mxu0 %v539_v58  ;;  %v1249_v57 = vld [vmem:[%s3000_s2 + $0x6c8] sm:$0xff]  ;;  %v1280_v58 = vld [vmem:[%s3000_s2 + $0x7c0] sm:$0xff] }
  0x6e   :  { %1545 = vmatprep.subr.bf16.mxu1 %v555_v62  ;;  %v568_v62 = vpack.c.bf16 %v1249_v57, %v1248_v56  ;;  %v584_v2 = vpack.c.bf16 %v1281_v59, %v1280_v58  ;;  %v1290_v56 = vld [vmem:[%s3000_s2 + $0x808] sm:$0xff]  ;;  %v1321_v57 = vld [vmem:[%s3000_s2 + $0x900] sm:$0xff] }
  0x6f   :  { %v1322_v59 = vld [vmem:[%s3000_s2 + $0x908] sm:$0xff]  ;;  %v881_v0 = vpack.c.bf16 %v1290_v56, %v1289_v55 }
  0x70   :  { %1524 = vmatpush3.bf16.msra.mxu0 %v531_v4  ;;  %v1250_v4 = vld [vmem:[%s3000_s2 + $0x6d0] sm:$0xff] }
  0x71   :  { %1546 = vmatpush3.bf16.msra.mxu1 %v547_v5  ;;  %1553 = vmatprep.subr.bf16.mxu0 %v564_v6  ;;  %v1251_v5 = vld [vmem:[%s3000_s2 + $0x6d8] sm:$0xff]  ;;  %v1282_v6 = vld [vmem:[%s3000_s2 + $0x7d0] sm:$0xff] }
  0x72   :  { %1575 = vmatprep.subr.bf16.mxu1 %v580_v10  ;;  %v569_v10 = vpack.c.bf16 %v1251_v5, %v1250_v4  ;;  %v585_v14 = vpack.c.bf16 %v1283_v7, %v1282_v6  ;;  %v1292_v4 = vld [vmem:[%s3000_s2 + $0x818] sm:$0xff]  ;;  %v1323_v5 = vld [vmem:[%s3000_s2 + $0x910] sm:$0xff] }
  0x73   :  { %621 = vmatmul.mubr.bf16.vlgmr.msra.gmra.mrb[8].mxu0 %v1995_v50  ;;  %v1324_v6 = vld [vmem:[%s3000_s2 + $0x918] sm:$0xff] }
  0x74   :  { %661 = vmatmul.mubr.bf16.vlgmr.msra.gmra.mrb[8].mxu1 %v2003_v53  ;;  %1554 = vmatpush3.bf16.msra.mxu0 %v556_v16  ;;  %v1252_v16 = vld [vmem:[%s3000_s2 + $0x6e0] sm:$0xff] }
  0x75   :  { %1576 = vmatpush3.bf16.msra.mxu1 %v572_v17  ;;  %1555 = vmatprep.subr.bf16.mxu0 %v565_v18  ;;  %v1253_v17 = vld [vmem:[%s3000_s2 + $0x6e8] sm:$0xff]  ;;  %v1284_v18 = vld [vmem:[%s3000_s2 + $0x7e0] sm:$0xff] }
  0x76   :  { %1577 = vmatprep.subr.bf16.mxu1 %v581_v24  ;;  %700 = vmatprep.mubr.bf16.mxu0 %v2094_v36  ;;  %v570_v24 = vpack.c.bf16 %v1253_v17, %v1252_v16  ;;  %v586_v28 = vpack.c.bf16 %v1285_v19, %v1284_v18 }
  0x77   :  { %740 = vmatprep.mubr.bf16.mxu1 %v2096_v37 }
  0x78   :  { %1556 = vmatpush3.bf16.msra.mxu0 %v557_v30  ;;  %v1254_v30 = vld [vmem:[%s3000_s2 + $0x6f0] sm:$0xff] }
  0x79   :  { %1578 = vmatpush3.bf16.msra.mxu1 %v573_v31  ;;  %1557 = vmatprep.subr.bf16.mxu0 %v566_v33  ;;  %v1255_v31 = vld [vmem:[%s3000_s2 + $0x6f8] sm:$0xff]  ;;  %v1286_v33 = vld [vmem:[%s3000_s2 + $0x7f0] sm:$0xff] }
  0x7a   :  { %1579 = vmatprep.subr.bf16.mxu1 %v582_v40  ;;  %v571_v40 = vpack.c.bf16 %v1255_v31, %v1254_v30  ;;  %v587_v44 = vpack.c.bf16 %v1287_v34, %v1286_v33 }
  0x7c   :  { %1558 = vmatpush3.bf16.msra.mxu0 %v558_v46  ;;  %v1305_v46 = vld [vmem:[%s3000_s2 + $0x880] sm:$0xff] }
  0x7d   :  { %1580 = vmatpush3.bf16.msra.mxu1 %v574_v47  ;;  %1559 = vmatprep.subr.bf16.mxu0 %v567_v48  ;;  %v1306_v47 = vld [vmem:[%s3000_s2 + $0x888] sm:$0xff]  ;;  %v1337_v48 = vld [vmem:[%s3000_s2 + $0x980] sm:$0xff] }
  0x7e   :  { %1581 = vmatprep.subr.bf16.mxu1 %v583_v54  ;;  %v889_v54 = vpack.c.bf16 %v1306_v47, %v1305_v46  ;;  %v905_v58 = vpack.c.bf16 %v1338_v49, %v1337_v48 }
  0x80   :  { %1560 = vmatpush3.bf16.msra.mxu0 %v559_v60  ;;  %v1307_v60 = vld [vmem:[%s3000_s2 + $0x890] sm:$0xff] }
  0x81   :  { %1582 = vmatpush3.bf16.msra.mxu1 %v575_v61  ;;  %1561 = vmatprep.subr.bf16.mxu0 %v568_v62  ;;  %v1308_v61 = vld [vmem:[%s3000_s2 + $0x898] sm:$0xff]  ;;  %v1339_v62 = vld [vmem:[%s3000_s2 + $0x990] sm:$0xff] }
  0x82   :  { %1583 = vmatprep.subr.bf16.mxu1 %v584_v2  ;;  %v897_v2 = vpack.c.bf16 %v1322_v59, %v1321_v57  ;;  %v890_v3 = vpack.c.bf16 %v1308_v61, %v1307_v60  ;;  %v906_v7 = vpack.c.bf16 %v1340_v63, %v1339_v62 }
  0x84   :  { %1562 = vmatpush3.bf16.msra.mxu0 %v560_v8  ;;  %v1309_v8 = vld [vmem:[%s3000_s2 + $0x8a0] sm:$0xff] }
  0x85   :  { %1584 = vmatpush3.bf16.msra.mxu1 %v576_v9  ;;  %1563 = vmatprep.subr.bf16.mxu0 %v569_v10  ;;  %v1310_v9 = vld [vmem:[%s3000_s2 + $0x8a8] sm:$0xff] }
  0x86   :  { %1585 = vmatprep.subr.bf16.mxu1 %v585_v14 }
  0x88   :  { %1564 = vmatpush3.bf16.msra.mxu0 %v561_v20 }
  0x89   :  { %1586 = vmatpush3.bf16.msra.mxu1 %v577_v21  ;;  %1565 = vmatprep.subr.bf16.mxu0 %v570_v24 }
  0x8a   :  { %1587 = vmatprep.subr.bf16.mxu1 %v586_v28 }
  0x8c   :  { %1566 = vmatpush3.bf16.msra.mxu0 %v562_v38 }
  0x8d   :  { %1588 = vmatpush3.bf16.msra.mxu1 %v578_v39  ;;  %1567 = vmatprep.subr.bf16.mxu0 %v571_v40 }
  0x8e   :  { %1589 = vmatprep.subr.bf16.mxu1 %v587_v44 }
  0x90   :  { %1568 = vmatpush3.bf16.msra.mxu0 %v563_v51 }
  0x91   :  { %1590 = vmatpush3.bf16.msra.mxu1 %v579_v52  ;;  %1597 = vmatprep.subr.bf16.mxu0 %v889_v54 }
  0x92   :  { %1619 = vmatprep.subr.bf16.mxu1 %v905_v58 }
  0x93   :  { %15 = vsyncpa [#allocation5], 0  ;;  %701 = vmatmul.mubr.bf16.vlgmr.msra.gmra.mrb[12].mxu0 %v2211_v32  ;;  %v1341_v10 = vld [vmem:[%s3000_s2 + $0x9a0] sm:$0xff]  ;;  %v1342_v11 = vld [vmem:[%s3000_s2 + $0x9a8] sm:$0xff]  ;;  %v882_v12 = vpack.c.bf16 %v1292_v4, %v1291_v1  ;;  %v898_v13 = vpack.c.bf16 %v1324_v6, %v1323_v5  ;;  %v891_v14 = vpack.c.bf16 %v1310_v9, %v1309_v8  ;;  %s2973_s29 = sld [smem:[#allocation3 + $0x1]]  ;;  %s1288_s30 = sld [smem:[#allocation3 + $0x2]] }
  0x94   :  { %741 = vmatmul.mubr.bf16.vlgmr.msra.gmra.mrb[12].mxu1 %v2219_v35  ;;  %1598 = vmatpush3.bf16.msra.mxu0 %v881_v0  ;;  %v1293_v15 = vld [vmem:[%s3000_s2 + $0x820] sm:$0xff]  ;;  %v1294_v16 = vld [vmem:[%s3000_s2 + $0x828] sm:$0xff]  ;;  %v907_v18 = vpack.c.bf16 %v1342_v11, %v1341_v10  ;;  %v1311_v20 = vld [vmem:[%s3000_s2 + $0x8b0] sm:$0xff]  ;;  %vm1135_vm0 = vcmask 80896  }
  0x95   :  { %1620 = vmatpush3.bf16.msra.mxu1 %v897_v2  ;;  %1599 = vmatprep.subr.bf16.mxu0 %v890_v3  ;;  %v1325_v17 = vld [vmem:[%s3000_s2 + $0x920] sm:$0xff]  ;;  %v1326_v19 = vld [vmem:[%s3000_s2 + $0x928] sm:$0xff]  ;;  %v1312_v21 = vld [vmem:[%s3000_s2 + $0x8b8] sm:$0xff]  ;;  %v883_v26 = vpack.c.bf16 %v1294_v16, %v1293_v15 }
  0x96   :  { %1621 = vmatprep.subr.bf16.mxu1 %v906_v7  ;;  %977 = vmatprep.mubr.bf16.mxu0 %v1935_v22  ;;  %v1343_v24 = vld [vmem:[%s3000_s2 + $0x9b0] sm:$0xff]  ;;  %v1344_v25 = vld [vmem:[%s3000_s2 + $0x9b8] sm:$0xff]  ;;  %v899_v27 = vpack.c.bf16 %v1326_v19, %v1325_v17  ;;  %v892_v28 = vpack.c.bf16 %v1312_v21, %v1311_v20  ;;  %v1313_v33 = vld [vmem:[%s3000_s2 + $0x8c0] sm:$0xff] }
  0x97   :  { %1017 = vmatprep.mubr.bf16.mxu1 %v1937_v23  ;;  %v1295_v22 = vld [vmem:[%s3000_s2 + $0x830] sm:$0xff]  ;;  %v1296_v29 = vld [vmem:[%s3000_s2 + $0x838] sm:$0xff]  ;;  %v908_v23 = vpack.c.bf16 %v1344_v25, %v1343_v24  ;;  %v1314_v34 = vld [vmem:[%s3000_s2 + $0x8c8] sm:$0xff] }
  0x98   :  { %1600 = vmatpush3.bf16.msra.mxu0 %v882_v12  ;;  %v1327_v30 = vld [vmem:[%s3000_s2 + $0x930] sm:$0xff]  ;;  %v1328_v31 = vld [vmem:[%s3000_s2 + $0x938] sm:$0xff]  ;;  %v1345_v38 = vld [vmem:[%s3000_s2 + $0x9c0] sm:$0xff]  ;;  %v884_v40 = vpack.c.bf16 %v1296_v29, %v1295_v22  ;;  %v893_v42 = vpack.c.bf16 %v1314_v34, %v1313_v33 }
  0x99   :  { %1622 = vmatpush3.bf16.msra.mxu1 %v898_v13  ;;  %1601 = vmatprep.subr.bf16.mxu0 %v891_v14  ;;  %v1346_v39 = vld [vmem:[%s3000_s2 + $0x9c8] sm:$0xff]  ;;  %v900_v41 = vpack.c.bf16 %v1328_v31, %v1327_v30  ;;  %v1297_v43 = vld [vmem:[%s3000_s2 + $0x840] sm:$0xff]  ;;  %v1315_v48 = vld [vmem:[%s3000_s2 + $0x8d0] sm:$0xff] }
  0x9a   :  { %1623 = vmatprep.subr.bf16.mxu1 %v907_v18  ;;  %v1298_v44 = vld [vmem:[%s3000_s2 + $0x848] sm:$0xff]  ;;  %v1329_v45 = vld [vmem:[%s3000_s2 + $0x940] sm:$0xff]  ;;  %v909_v46 = vpack.c.bf16 %v1346_v39, %v1345_v38  ;;  %v1316_v49 = vld [vmem:[%s3000_s2 + $0x8d8] sm:$0xff] }
  0x9b   :  { %v1330_v47 = vld [vmem:[%s3000_s2 + $0x948] sm:$0xff]  ;;  %v1347_v51 = vld [vmem:[%s3000_s2 + $0x9d0] sm:$0xff]  ;;  %v1348_v52 = vld [vmem:[%s3000_s2 + $0x9d8] sm:$0xff]  ;;  %v885_v54 = vpack.c.bf16 %v1298_v44, %v1297_v43  ;;  %v894_v56 = vpack.c.bf16 %v1316_v49, %v1315_v48 }
  0x9c   :  { %1602 = vmatpush3.bf16.msra.mxu0 %v883_v26  ;;  %v901_v55 = vpack.c.bf16 %v1330_v47, %v1329_v45  ;;  %v1299_v57 = vld [vmem:[%s3000_s2 + $0x850] sm:$0xff]  ;;  %v1300_v58 = vld [vmem:[%s3000_s2 + $0x858] sm:$0xff]  ;;  %v910_v60 = vpack.c.bf16 %v1348_v52, %v1347_v51  ;;  %v1317_v62 = vld [vmem:[%s3000_s2 + $0x8e0] sm:$0xff] }
  0x9d   :  { %1624 = vmatpush3.bf16.msra.mxu1 %v899_v27  ;;  %1603 = vmatprep.subr.bf16.mxu0 %v892_v28  ;;  %v1331_v59 = vld [vmem:[%s3000_s2 + $0x950] sm:$0xff]  ;;  %v1332_v61 = vld [vmem:[%s3000_s2 + $0x958] sm:$0xff]  ;;  %v1318_v63 = vld [vmem:[%s3000_s2 + $0x8e8] sm:$0xff]  ;;  %v886_v2 = vpack.c.bf16 %v1300_v58, %v1299_v57 }
  0x9e   :  { %1625 = vmatprep.subr.bf16.mxu1 %v908_v23  ;;  %v1349_v0 = vld [vmem:[%s3000_s2 + $0x9e0] sm:$0xff]  ;;  %v1350_v1 = vld [vmem:[%s3000_s2 + $0x9e8] sm:$0xff]  ;;  %v902_v3 = vpack.c.bf16 %v1332_v61, %v1331_v59  ;;  %v895_v4 = vpack.c.bf16 %v1318_v63, %v1317_v62  ;;  %v1319_v10 = vld [vmem:[%s3000_s2 + $0x8f0] sm:$0xff] }
  0x9f   :  { %v1301_v5 = vld [vmem:[%s3000_s2 + $0x860] sm:$0xff]  ;;  %v1302_v6 = vld [vmem:[%s3000_s2 + $0x868] sm:$0xff]  ;;  %v911_v8 = vpack.c.bf16 %v1350_v1, %v1349_v0  ;;  %v1320_v11 = vld [vmem:[%s3000_s2 + $0x8f8] sm:$0xff] }
  0xa0   :  { %1604 = vmatpush3.bf16.msra.mxu0 %v884_v40  ;;  %v1333_v7 = vld [vmem:[%s3000_s2 + $0x960] sm:$0xff]  ;;  %v1334_v9 = vld [vmem:[%s3000_s2 + $0x968] sm:$0xff]  ;;  %v1351_v12 = vld [vmem:[%s3000_s2 + $0x9f0] sm:$0xff]  ;;  %v887_v14 = vpack.c.bf16 %v1302_v6, %v1301_v5  ;;  %v896_v16 = vpack.c.bf16 %v1320_v11, %v1319_v10 }
  0xa1   :  { %1626 = vmatpush3.bf16.msra.mxu1 %v900_v41  ;;  %1605 = vmatprep.subr.bf16.mxu0 %v893_v42  ;;  %v1352_v13 = vld [vmem:[%s3000_s2 + $0x9f8] sm:$0xff]  ;;  %v903_v15 = vpack.c.bf16 %v1334_v9, %v1333_v7  ;;  %v1303_v17 = vld [vmem:[%s3000_s2 + $0x870] sm:$0xff]  ;;  %v1369_v24 = vld [vmem:[%s3000_s2 + $0xa80] sm:$0xff] }
  0xa2   :  { %1627 = vmatprep.subr.bf16.mxu1 %v909_v46  ;;  %v1304_v18 = vld [vmem:[%s3000_s2 + $0x878] sm:$0xff]  ;;  %v1335_v19 = vld [vmem:[%s3000_s2 + $0x970] sm:$0xff]  ;;  %v912_v20 = vpack.c.bf16 %v1352_v13, %v1351_v12  ;;  %v1370_v25 = vld [vmem:[%s3000_s2 + $0xa88] sm:$0xff] }
  0xa3   :  { %v1336_v21 = vld [vmem:[%s3000_s2 + $0x978] sm:$0xff]  ;;  %v1401_v26 = vld [vmem:[%s3000_s2 + $0xb80] sm:$0xff]  ;;  %v1402_v27 = vld [vmem:[%s3000_s2 + $0xb88] sm:$0xff]  ;;  %v888_v28 = vpack.c.bf16 %v1304_v18, %v1303_v17  ;;  %v921_v29 = vpack.c.bf16 %v1370_v25, %v1369_v24 }
  0xa4   :  { %1606 = vmatpush3.bf16.msra.mxu0 %v885_v54  ;;  %v904_v22 = vpack.c.bf16 %v1336_v21, %v1335_v19  ;;  %v1353_v30 = vld [vmem:[%s3000_s2 + $0xa00] sm:$0xff]  ;;  %v1354_v23 = vld [vmem:[%s3000_s2 + $0xa08] sm:$0xff]  ;;  %v937_v33 = vpack.c.bf16 %v1402_v27, %v1401_v26  ;;  %v1371_v38 = vld [vmem:[%s3000_s2 + $0xa90] sm:$0xff] }
  0xa5   :  { %1628 = vmatpush3.bf16.msra.mxu1 %v901_v55  ;;  %1607 = vmatprep.subr.bf16.mxu0 %v894_v56  ;;  %v1385_v31 = vld [vmem:[%s3000_s2 + $0xb00] sm:$0xff]  ;;  %v1386_v34 = vld [vmem:[%s3000_s2 + $0xb08] sm:$0xff]  ;;  %v1372_v39 = vld [vmem:[%s3000_s2 + $0xa98] sm:$0xff]  ;;  %v913_v42 = vpack.c.bf16 %v1354_v23, %v1353_v30 }
  0xa6   :  { %1629 = vmatprep.subr.bf16.mxu1 %v910_v60  ;;  %v1403_v40 = vld [vmem:[%s3000_s2 + $0xb90] sm:$0xff]  ;;  %v1404_v41 = vld [vmem:[%s3000_s2 + $0xb98] sm:$0xff]  ;;  %v929_v43 = vpack.c.bf16 %v1386_v34, %v1385_v31  ;;  %v922_v44 = vpack.c.bf16 %v1372_v39, %v1371_v38  ;;  %v1373_v51 = vld [vmem:[%s3000_s2 + $0xaa0] sm:$0xff] }
  0xa7   :  { %v1355_v45 = vld [vmem:[%s3000_s2 + $0xa10] sm:$0xff]  ;;  %v1356_v46 = vld [vmem:[%s3000_s2 + $0xa18] sm:$0xff]  ;;  %v938_v48 = vpack.c.bf16 %v1404_v41, %v1403_v40  ;;  %v1374_v52 = vld [vmem:[%s3000_s2 + $0xaa8] sm:$0xff] }
  0xa8   :  { %1608 = vmatpush3.bf16.msra.mxu0 %v886_v2  ;;  %v1387_v47 = vld [vmem:[%s3000_s2 + $0xb10] sm:$0xff]  ;;  %v1388_v49 = vld [vmem:[%s3000_s2 + $0xb18] sm:$0xff]  ;;  %v1405_v54 = vld [vmem:[%s3000_s2 + $0xba0] sm:$0xff]  ;;  %v914_v56 = vpack.c.bf16 %v1356_v46, %v1355_v45  ;;  %v923_v58 = vpack.c.bf16 %v1374_v52, %v1373_v51 }
  0xa9   :  { %1630 = vmatpush3.bf16.msra.mxu1 %v902_v3  ;;  %1609 = vmatprep.subr.bf16.mxu0 %v895_v4  ;;  %v1406_v55 = vld [vmem:[%s3000_s2 + $0xba8] sm:$0xff]  ;;  %v930_v57 = vpack.c.bf16 %v1388_v49, %v1387_v47  ;;  %v1389_v60 = vld [vmem:[%s3000_s2 + $0xb20] sm:$0xff]  ;;  %v1375_v62 = vld [vmem:[%s3000_s2 + $0xab0] sm:$0xff] }
  0xaa   :  { %1631 = vmatprep.subr.bf16.mxu1 %v911_v8  ;;  %v1358_v59 = vld [vmem:[%s3000_s2 + $0xa28] sm:$0xff]  ;;  %v1376_v63 = vld [vmem:[%s3000_s2 + $0xab8] sm:$0xff]  ;;  %v1407_v0 = vld [vmem:[%s3000_s2 + $0xbb0] sm:$0xff] }
  0xab   :  { %v1390_v61 = vld [vmem:[%s3000_s2 + $0xb28] sm:$0xff]  ;;  %v1408_v1 = vld [vmem:[%s3000_s2 + $0xbb8] sm:$0xff]  ;;  %v924_v4 = vpack.c.bf16 %v1376_v63, %v1375_v62  ;;  %v1391_v6 = vld [vmem:[%s3000_s2 + $0xb30] sm:$0xff] }
  0xac   :  { %1610 = vmatpush3.bf16.msra.mxu0 %v887_v14  ;;  %v931_v3 = vpack.c.bf16 %v1390_v61, %v1389_v60  ;;  %v1360_v5 = vld [vmem:[%s3000_s2 + $0xa38] sm:$0xff]  ;;  %v1377_v8 = vld [vmem:[%s3000_s2 + $0xac0] sm:$0xff]  ;;  %v1378_v9 = vld [vmem:[%s3000_s2 + $0xac8] sm:$0xff] }
  0xad   :  { %1632 = vmatpush3.bf16.msra.mxu1 %v903_v15  ;;  %1611 = vmatprep.subr.bf16.mxu0 %v896_v16  ;;  %v1392_v7 = vld [vmem:[%s3000_s2 + $0xb38] sm:$0xff]  ;;  %v1409_v10 = vld [vmem:[%s3000_s2 + $0xbc0] sm:$0xff]  ;;  %v1410_v11 = vld [vmem:[%s3000_s2 + $0xbc8] sm:$0xff]  ;;  %v925_v14 = vpack.c.bf16 %v1378_v9, %v1377_v8 }
  0xae   :  { %1633 = vmatprep.subr.bf16.mxu1 %v912_v20  ;;  %v932_v13 = vpack.c.bf16 %v1392_v7, %v1391_v6  ;;  %v1361_v15 = vld [vmem:[%s3000_s2 + $0xa40] sm:$0xff]  ;;  %v1362_v16 = vld [vmem:[%s3000_s2 + $0xa48] sm:$0xff]  ;;  %v941_v18 = vpack.c.bf16 %v1410_v11, %v1409_v10  ;;  %v1379_v20 = vld [vmem:[%s3000_s2 + $0xad0] sm:$0xff] }
  0xaf   :  { %v1393_v17 = vld [vmem:[%s3000_s2 + $0xb40] sm:$0xff]  ;;  %v1394_v19 = vld [vmem:[%s3000_s2 + $0xb48] sm:$0xff]  ;;  %v1380_v21 = vld [vmem:[%s3000_s2 + $0xad8] sm:$0xff]  ;;  %v917_v26 = vpack.c.bf16 %v1362_v16, %v1361_v15 }
  0xb0   :  { %1612 = vmatpush3.bf16.msra.mxu0 %v888_v28  ;;  %v1411_v24 = vld [vmem:[%s3000_s2 + $0xbd0] sm:$0xff]  ;;  %v1412_v25 = vld [vmem:[%s3000_s2 + $0xbd8] sm:$0xff]  ;;  %v933_v27 = vpack.c.bf16 %v1394_v19, %v1393_v17  ;;  %v926_v28 = vpack.c.bf16 %v1380_v21, %v1379_v20  ;;  %v1382_v34 = vld [vmem:[%s3000_s2 + $0xae8] sm:$0xff] }
  0xb1   :  { %1634 = vmatpush3.bf16.msra.mxu1 %v904_v22  ;;  %1641 = vmatprep.subr.bf16.mxu0 %v921_v29  ;;  %v1363_v22 = vld [vmem:[%s3000_s2 + $0xa50] sm:$0xff]  ;;  %v1364_v29 = vld [vmem:[%s3000_s2 + $0xa58] sm:$0xff]  ;;  %v942_v23 = vpack.c.bf16 %v1412_v25, %v1411_v24  ;;  %v1413_v38 = vld [vmem:[%s3000_s2 + $0xbe0] sm:$0xff] }
  0xb2   :  { %1663 = vmatprep.subr.bf16.mxu1 %v937_v33  ;;  %v1395_v30 = vld [vmem:[%s3000_s2 + $0xb50] sm:$0xff]  ;;  %v1396_v31 = vld [vmem:[%s3000_s2 + $0xb58] sm:$0xff]  ;;  %v1381_v33 = vld [vmem:[%s3000_s2 + $0xae0] sm:$0xff]  ;;  %v918_v40 = vpack.c.bf16 %v1364_v29, %v1363_v22 }
  0xb3   :  { %978 = vmatmul.mubr.bf16.vlgmr.msra.gmra.mrb[16].mxu0 %v1995_v50  ;;  %v1357_v50 = vld [vmem:[%s3000_s2 + $0xa20] sm:$0xff]  ;;  %v1414_v39 = vld [vmem:[%s3000_s2 + $0xbe8] sm:$0xff]  ;;  %v934_v41 = vpack.c.bf16 %v1396_v31, %v1395_v30  ;;  %v1384_v49 = vld [vmem:[%s3000_s2 + $0xaf8] sm:$0xff] }
  0xb4   :  { %1018 = vmatmul.mubr.bf16.vlgmr.msra.gmra.mrb[16].mxu1 %v2003_v53  ;;  %1642 = vmatpush3.bf16.msra.mxu0 %v913_v42  ;;  %v939_v53 = vpack.c.bf16 %v1406_v55, %v1405_v54  ;;  %v915_v2 = vpack.c.bf16 %v1358_v59, %v1357_v50  ;;  %v927_v42 = vpack.c.bf16 %v1382_v34, %v1381_v33  ;;  %v1397_v45 = vld [vmem:[%s3000_s2 + $0xb60] sm:$0xff]  ;;  %v1398_v47 = vld [vmem:[%s3000_s2 + $0xb68] sm:$0xff]  ;;  %v1415_v51 = vld [vmem:[%s3000_s2 + $0xbf0] sm:$0xff] }
  0xb5   :  { %1664 = vmatpush3.bf16.msra.mxu1 %v929_v43  ;;  %1643 = vmatprep.subr.bf16.mxu0 %v922_v44  ;;  %v1365_v43 = vld [vmem:[%s3000_s2 + $0xa60] sm:$0xff]  ;;  %v1366_v44 = vld [vmem:[%s3000_s2 + $0xa68] sm:$0xff]  ;;  %v943_v46 = vpack.c.bf16 %v1414_v39, %v1413_v38  ;;  %v1416_v52 = vld [vmem:[%s3000_s2 + $0xbf8] sm:$0xff]  ;;  %v935_v55 = vpack.c.bf16 %v1398_v47, %v1397_v45 }
  0xb6   :  { %1665 = vmatprep.subr.bf16.mxu1 %v938_v48  ;;  %1057 = vmatprep.mubr.bf16.mxu0 %v2094_v36  ;;  %v1359_v36 = vld [vmem:[%s3000_s2 + $0xa30] sm:$0xff]  ;;  %v919_v54 = vpack.c.bf16 %v1366_v44, %v1365_v43  ;;  %v944_v50 = vpack.c.bf16 %v1416_v52, %v1415_v51  ;;  %v1400_v60 = vld [vmem:[%s3000_s2 + $0xb78] sm:$0xff]  ;;  %v748_v44 = vstv %s2973_s29 }
  0xb7   :  { %1097 = vmatprep.mubr.bf16.mxu1 %v2096_v37  ;;  %v940_v37 = vpack.c.bf16 %v1408_v1, %v1407_v0  ;;  %v916_v12 = vpack.c.bf16 %v1360_v5, %v1359_v36  ;;  %v1383_v48 = vld [vmem:[%s3000_s2 + $0xaf0] sm:$0xff] }
  0xb8   :  { %1644 = vmatpush3.bf16.msra.mxu0 %v914_v56  ;;  %v928_v56 = vpack.c.bf16 %v1384_v49, %v1383_v48  ;;  %v1399_v59 = vld [vmem:[%s3000_s2 + $0xb70] sm:$0xff] }
  0xb9   :  { %1666 = vmatpush3.bf16.msra.mxu1 %v930_v57  ;;  %1645 = vmatprep.subr.bf16.mxu0 %v923_v58  ;;  %v1367_v57 = vld [vmem:[%s3000_s2 + $0xa70] sm:$0xff]  ;;  %v1368_v58 = vld [vmem:[%s3000_s2 + $0xa78] sm:$0xff]  ;;  %v936_v61 = vpack.c.bf16 %v1400_v60, %v1399_v59  ;;  %s2971_s2 = sld [smem:[#allocation3]] }
  0xba   :  { %1667 = vmatprep.subr.bf16.mxu1 %v939_v53  ;;  %v920_v53 = vpack.c.bf16 %v1368_v58, %v1367_v57 }
  0xbc   :  { %1646 = vmatpush3.bf16.msra.mxu0 %v915_v2 }
  0xbd   :  { %1668 = vmatpush3.bf16.msra.mxu1 %v931_v3  ;;  %1647 = vmatprep.subr.bf16.mxu0 %v924_v4 }
  0xbe   :  { %1669 = vmatprep.subr.bf16.mxu1 %v940_v37 }
  0xbf   :  { %v392_v43 = vstv %s2971_s2 }
  0xc0   :  { %1648 = vmatpush3.bf16.msra.mxu0 %v916_v12 }
  0xc1   :  { %1670 = vmatpush3.bf16.msra.mxu1 %v932_v13  ;;  %1649 = vmatprep.subr.bf16.mxu0 %v925_v14 }
  0xc2   :  { %1671 = vmatprep.subr.bf16.mxu1 %v941_v18 }
  0xc4   :  { %1650 = vmatpush3.bf16.msra.mxu0 %v917_v26 }
  0xc5   :  { %1672 = vmatpush3.bf16.msra.mxu1 %v933_v27  ;;  %1651 = vmatprep.subr.bf16.mxu0 %v926_v28 }
  0xc6   :  { %1673 = vmatprep.subr.bf16.mxu1 %v942_v23 }
  0xc8   :  { %1652 = vmatpush3.bf16.msra.mxu0 %v918_v40 }
  0xc9   :  { %1674 = vmatpush3.bf16.msra.mxu1 %v934_v41  ;;  %1653 = vmatprep.subr.bf16.mxu0 %v927_v42 }
  0xca   :  { %1675 = vmatprep.subr.bf16.mxu1 %v943_v46 }
  0xcc   :  { %1654 = vmatpush3.bf16.msra.mxu0 %v919_v54 }
  0xcd   :  { %1676 = vmatpush3.bf16.msra.mxu1 %v935_v55  ;;  %1655 = vmatprep.subr.bf16.mxu0 %v928_v56 }
  0xce   :  { %1677 = vmatprep.subr.bf16.mxu1 %v944_v50 }
  0xd0   :  { %1656 = vmatpush3.bf16.msra.mxu0 %v920_v53  ;;  %v1113_v53 = vld [vmem:[%s3001_s3] sm:$0x1] }
  0xd1   :  { %1678 = vmatpush3.bf16.msra.mxu1 %v936_v61  ;;  %v1418_v61 = vld [vmem:[%s3001_s3 + $0x1] sm:$0x1] }
  0xd3   :  { %1058 = vmatmul.mubr.bf16.vlgmr.msra.gmra.mrb[20].mxu0 %v2211_v32 }
  0xd4   :  { %1098 = vmatmul.mubr.bf16.vlgmr.msra.gmra.mrb[20].mxu1 %v2219_v35 }
 0x106   :  { %v1437_v62 = vpop.f32.mrb[0].mxu0 }
 0x107   :  { %v1459_v63 = vpop.f32.mrb[0].mxu1  ;;  %v1438_v0 = vpop.f32.mrb[1].mxu0 }
 0x108   :  { %v1439_v1 = vadd.f32 %v1438_v0, %v1437_v62  ;;  %v1460_v2 = vpop.f32.mrb[1].mxu1  ;;  %v1440_v3 = vpop.f32.mrb[2].mxu0  ;;  %v1115_v62 = vmul.f32 %v1113_v53, %v392_v43  ;;  %v1129_v0 = vlaneseq }
 0x109   :  { %v1461_v4 = vadd.f32 %v1460_v2, %v1459_v63  ;;  %v1462_v36 = vpop.f32.mrb[2].mxu1  ;;  %v1441_v5 = vpop.f32.mrb[3].mxu0  ;;  %v1120_v63 = vmul.f32 %v1418_v61, %v748_v44  ;;  %v1420_v2 = vld [vmem:[%s3001_s3 + $0x2] sm:$0x1]  ;;  %s1726_s3 = smov [#allocation4]  }
 0x10a   :  { %v1463_v6 = vpop.f32.mrb[3].mxu1  ;;  %v1130_v5 = vshrl.u32 %v1129_v0, 7  ;;  %s1151_s10 = sshll.u32 %s1726_s3, 4  ;;  %s1152_s10 = int_to_ptr.vmem [resolvable:$true] %s1151_s10 }
 0x10b   :  { %v307_v37 = vadd.f32 %v1461_v4, %v1439_v1  ;;  %v1105_v1 = vstv %s1288_s30  ;;  %v1121_v4 = vadd.f32 %v1120_v63, %v1115_v62  ;;  %s1699_s11 = scalar_lea.vmem %s1152_s10, 128  ;;  %p1704_p6 = scmp.lt.s32.totalorder %s1152_s10, %s1152_s10 }
 0x10c   :  { %v1126_v36 = vmul.f32 %v1420_v2, %v1105_v1  ;;  %p1700_p5 = scmp.ne.s32.totalorder %s1152_s10, %s1699_s11  ;;  %p1705_p7 = scmp.lt.s32.totalorder %s1699_s11, %s1699_s11 }
 0x10e   :  { %p1706_p8 = por %p1705_p7, %p1704_p6 }
 0x110   :  { %p1707_p9 = pnand %p1706_p8, %p1700_p5 }
 0x126   :  { %v1481_v7 = vpop.f32.mrb[4].mxu0 }
 0x127   :  { %v1503_v8 = vpop.f32.mrb[4].mxu1  ;;  %v1482_v9 = vpop.f32.mrb[5].mxu0 }
 0x128   :  { %v1483_v10 = vadd.f32 %v1482_v9, %v1481_v7  ;;  %v1504_v11 = vpop.f32.mrb[5].mxu1  ;;  %v1484_v12 = vpop.f32.mrb[6].mxu0 }
 0x129   :  { %v1505_v32 = vadd.f32 %v1504_v11, %v1503_v8  ;;  %v1506_v13 = vpop.f32.mrb[6].mxu1  ;;  %v1485_v35 = vpop.f32.mrb[7].mxu0 }
 0x12a   :  { %v347_v14 = vadd.f32 %v1483_v10, %v307_v37  ;;  %v1507_v15 = vpop.f32.mrb[7].mxu1  ;;  %v1127_v35 = vadd.f32 %v1126_v36, %v1121_v4 }
 0x12c   :  { %v387_v16 = vadd.f32 %v1505_v32, %v347_v14  ;;  %v1131_v14 = vsub.s32 0, %v1130_v5 }
 0x12e   :  { %v393_v46 = vmul.f32 %v392_v43, %v387_v16 }
 0x146   :  { %v1525_v17 = vpop.f32.mrb[8].mxu0 }
 0x147   :  { %v1547_v18 = vpop.f32.mrb[8].mxu1  ;;  %v1526_v19 = vpop.f32.mrb[9].mxu0 }
 0x148   :  { %v1527_v20 = vadd.f32 %v1526_v19, %v1525_v17  ;;  %v1548_v21 = vpop.f32.mrb[9].mxu1  ;;  %v1528_v24 = vpop.f32.mrb[10].mxu0  ;;  %v1132_v17 = vrot.slane %v1127_v35, %v1131_v14 }
 0x149   :  { %v1549_v25 = vadd.f32 %v1548_v21, %v1547_v18  ;;  %v1550_v26 = vpop.f32.mrb[10].mxu1  ;;  %v1529_v27 = vpop.f32.mrb[11].mxu0 }
 0x14a   :  { %v1551_v28 = vpop.f32.mrb[11].mxu1 }
 0x14b   :  { %v663_v22 = vadd.f32 %v1549_v25, %v1527_v20 }
 0x166   :  { %v1569_v29 = vpop.f32.mrb[12].mxu0 }
 0x167   :  { %v1591_v30 = vpop.f32.mrb[12].mxu1  ;;  %v1570_v23 = vpop.f32.mrb[13].mxu0 }
 0x168   :  { %v1571_v31 = vadd.f32 %v1570_v23, %v1569_v29  ;;  %v1592_v33 = vpop.f32.mrb[13].mxu1  ;;  %v1572_v34 = vpop.f32.mrb[14].mxu0 }
 0x169   :  { %v1593_v38 = vadd.f32 %v1592_v33, %v1591_v30  ;;  %v1594_v39 = vpop.f32.mrb[14].mxu1  ;;  %v1573_v40 = vpop.f32.mrb[15].mxu0 }
 0x16a   :  { %v703_v41 = vadd.f32 %v1571_v31, %v663_v22  ;;  %v1595_v42 = vpop.f32.mrb[15].mxu1 }
 0x16c   :  { %v743_v45 = vadd.f32 %v1593_v38, %v703_v41 }
 0x16e   :  { %v749_v47 = vmul.f32 %v748_v44, %v743_v45 }
 0x170   :  { %v750_v48 = vadd.f32 %v749_v47, %v393_v46 }
 0x186   :  { %v1613_v49 = vpop.f32.mrb[16].mxu0 }
 0x187   :  { %v1635_v51 = vpop.f32.mrb[16].mxu1  ;;  %v1614_v52 = vpop.f32.mrb[17].mxu0 }
 0x188   :  { %v1615_v54 = vadd.f32 %v1614_v52, %v1613_v49  ;;  %v1636_v55 = vpop.f32.mrb[17].mxu1  ;;  %v1616_v56 = vpop.f32.mrb[18].mxu0 }
 0x189   :  { %v1637_v57 = vadd.f32 %v1636_v55, %v1635_v51  ;;  %v1638_v58 = vpop.f32.mrb[18].mxu1  ;;  %v1617_v50 = vpop.f32.mrb[19].mxu0 }
 0x18a   :  { %v1639_v59 = vpop.f32.mrb[19].mxu1 }
 0x18b   :  { %v1020_v60 = vadd.f32 %v1637_v57, %v1615_v54 }
 0x1a6   :  { %v1657_v3 = vpop.f32.mrb[20].mxu0 }
 0x1a7   :  { %v1679_v6 = vpop.f32.mrb[20].mxu1  ;;  %v1658_v37 = vpop.f32.mrb[21].mxu0 }
 0x1a8   :  { %v1659_v7 = vadd.f32 %v1658_v37, %v1657_v3  ;;  %v1680_v8 = vpop.f32.mrb[21].mxu1  ;;  %v1660_v9 = vpop.f32.mrb[22].mxu0 }
 0x1a9   :  { %v1681_v10 = vadd.f32 %v1680_v8, %v1679_v6  ;;  %v1682_v11 = vpop.f32.mrb[22].mxu1  ;;  %v1661_v12 = vpop.f32.mrb[23].mxu0 }
 0x1aa   :  { %v1060_v32 = vadd.f32 %v1659_v7, %v1020_v60  ;;  %v1683_v13 = vpop.f32.mrb[23].mxu1 }
 0x1ac   :  { %v1100_v15 = vadd.f32 %v1681_v10, %v1060_v32 }
 0x1ae   :  { %v1106_v16 = vmul.f32 %v1105_v1, %v1100_v15 }
 0x1b0   :  { %v1107_v18 = vadd.f32 %v1106_v16, %v750_v48 }
 0x1b2   :  { %v1134_v19 = vadd.f32 %v1132_v17, %v1107_v18 }
 0x1b4   :  { %1136 = vst.msk [vmem:[#allocation4] sm:$0xff] %vm1135_vm0, %v1134_v19 }
 0x1b5   :  { %1710 = shalt.err (!%p1707_p9)
}
 0x1b6   :  { %s1711_s14 = scalar_lea.hbm %s3002_s4, 128 }
 0x1b7   :  { %p1712_p10 = scmp.ne.s32.totalorder %s3002_s4, %s1711_s14  ;;  %p1715_p11 = scmp.lt.u32.totalorder %s1711_s14, %s3002_s4 }
 0x1b9   :  { %p1717_p12 = pnand %p1715_p11, %p1712_p10 }
 0x1bb   :  { %1720 = shalt.err (!%p1717_p12)
}
 0x1bc   :  { %1154 = dma.vmem_to_hbm [thread:$0]  %s1152_s10, 128, %s3002_s4, [#allocation5]  }
 0x1bd   :  { %1723 = dma.done.wait [#allocation5], 128  }
 0x1be   :  { %1724 = vsyncadd [#allocation5], 4294967168 }
 0x1bf   :  { %1158 = vsyncpa [#allocation5], 1 }

</bundles_post_ra>
